<compile_context>
chip_gen: v5e
topology: v5e:2x2
jax: 0.10.0
libtpu: 0.0.40
codegen_flags: <defaults>
</compile_context>

<pallas_src>
import math
from functools import partial

import jax
import jax.numpy as jnp
from jax.experimental import pallas as pl
from jax.experimental.pallas import tpu as pltpu

HIDDEN = 32
LN_EPS = 1e-5

NODE_TYPES = ["ntA", "ntB"]
EDGE_TYPES = [("ntA", "to", "ntB"), ("ntB", "to", "ntA")]
NUM_NODES = {"ntA": 16, "ntB": 16}
NUM_EDGES = 24

NUM_W = 2 * len(EDGE_TYPES) + 2 * len(NODE_TYPES)   # 8   stacked (32,32) matmuls
NUM_V = 8 * len(EDGE_TYPES) + 4 * len(NODE_TYPES)   # 24  stacked (1,32) bias/LN/edge-lin rows


def et_key(et):
    return "__".join(et)


# ----------------------------- fused Pallas kernel -----------------------------

def _hetero_gine_kernel(e_split, x_ref, src_ref, dst_ref, ea_ref, w_ref, v_ref,
                        oa_ref, ob_ref):
    """Whole HeteroGINE forward (both edge types + both node types) in one invocation.

    x_ref   : (nA+nB, H) node slab [x_A ; x_B]
    src_ref : (E_total, 1) int32  gather rows into the node slab
    dst_ref : (1, E_total) int32  scatter rows into the node slab
    ea_ref  : (E_total, 1) f32    scalar edge attributes
    w_ref   : (8, H, H)           stacked matmul weights
    v_ref   : (24, H)             stacked bias / LN / edge-lin rows
    First `e_split` edges belong to edge type 0 (A->B), the rest to edge type 1 (B->A).
    """
    na = oa_ref.shape[0]
    nb = ob_ref.shape[0]
    n_all = na + nb
    e_all = src_ref.shape[0]
    h = x_ref.shape[1]

    def vrow(k):                                   # (1, H) bias / LN row, static k
        return v_ref[pl.ds(k, 1), :]

    def layer_norm(y, g_idx, b_idx):
        mu = jnp.mean(y, axis=-1, keepdims=True)
        var = jnp.mean((y - mu) ** 2, axis=-1, keepdims=True)
        return (y - mu) * jax.lax.rsqrt(var + LN_EPS) * vrow(g_idx) + vrow(b_idx)

    def linear(y, w_idx, b_idx):
        return jnp.dot(y, w_ref[w_idx], preferred_element_type=jnp.float32) + vrow(b_idx)

    x_all = x_ref[...]                             # (n_all, H)
    src_col = src_ref[...]                         # (e_all, 1)
    dst_row = dst_ref[...]                         # (1, e_all)
    ea = ea_ref[...]                               # (e_all, 1)

    # ---- merged message path (both edge types at once) ----
    # Linear(1 -> H) on the scalar edge attribute; per-edge-type params selected with a
    # sublane mask (first e_split edges use edge type 0's row, the rest edge type 1's).
    is_t1 = jax.lax.broadcasted_iota(jnp.int32, (e_all, h), 0) >= e_split
    w_e = jnp.where(is_t1, vrow(8 + 0), vrow(0))
    b_e = jnp.where(is_t1, vrow(8 + 1), vrow(1))
    e_proj = ea * w_e + b_e                        # (e_all, H)

    # gather x_j = x_all[src] as a one-hot matmul (stays in VMEM / MXU).
    # NOTE: out-of-range indices are silently dropped (all-zero one-hot row); the wrapper
    # is responsible for passing in-range indices.  Default (bf16-operand) MXU precision is
    # used here; pass precision=HIGHEST on these dots if tighter accuracy is needed.
    gmat = (jax.lax.broadcasted_iota(jnp.int32, (e_all, n_all), 1) == src_col
            ).astype(jnp.float32)                                            # (e_all, n_all)
    x_j = jnp.dot(gmat, x_all, preferred_element_type=jnp.float32)           # (e_all, H)

    msg = jnp.maximum(x_j + e_proj, 0.0)                                     # ReLU(x_j + e)

    # scatter-sum (segment_sum over destination slab rows) as a one-hot matmul.
    smat = (jax.lax.broadcasted_iota(jnp.int32, (n_all, e_all), 0) == dst_row
            ).astype(jnp.float32)                                            # (n_all, e_all)
    aggr = jnp.dot(smat, msg, preferred_element_type=jnp.float32)            # (n_all, H)

    # GINEConv: (1 + eps) * x_dst + aggr; eps = 0 (train_eps=False) folded at trace time.
    h_all = x_all + aggr

    # ---- per-type GINE "nn" stacks + post MLPs (different weights per type) ----
    def gine_nn(y, e_idx):                         # Sequential(Lin, LN, ReLU, Lin, LN, ReLU)
        vb, wb = 8 * e_idx, 2 * e_idx
        y = jnp.maximum(layer_norm(linear(y, wb + 0, vb + 2), vb + 3, vb + 4), 0.0)
        return jnp.maximum(layer_norm(linear(y, wb + 1, vb + 5), vb + 6, vb + 7), 0.0)

    def post_mlp(y, t_idx):                        # Sequential(Lin, LN, ReLU, Lin, ReLU)
        vb = 8 * len(EDGE_TYPES) + 4 * t_idx
        wb = 2 * len(EDGE_TYPES) + 2 * t_idx
        y = jnp.maximum(layer_norm(linear(y, wb + 0, vb + 0), vb + 1, vb + 2), 0.0)
        return jnp.maximum(linear(y, wb + 1, vb + 3), 0.0)

    # HeteroConv(aggr='sum'): with this metadata each node type is the destination of exactly
    # one edge type, so the per-destination sum has a single term.
    h_a = gine_nn(h_all[:na, :], 1)                # A nodes receive from edge type 1 (B->A)
    h_b = gine_nn(h_all[na:, :], 0)                # B nodes receive from edge type 0 (A->B)

    oa_ref[...] = post_mlp(h_a, 0)
    ob_ref[...] = post_mlp(h_b, 1)


def hetero_gine_pallas(w_all, v_all, x_all, src_col, dst_row, ea_col, *,
                       num_a, num_b, e_split):
    n_all, h = x_all.shape
    e_all = src_col.shape[0]
    assert n_all == num_a + num_b

    def full(shape):
        return pl.BlockSpec(shape, lambda i, _s=shape: (0,) * len(_s))

    out_a, out_b = pl.pallas_call(
        partial(_hetero_gine_kernel, e_split),
        out_shape=(jax.ShapeDtypeStruct((num_a, h), jnp.float32),
                   jax.ShapeDtypeStruct((num_b, h), jnp.float32)),
        grid=(1,),
        in_specs=[
            full((n_all, h)),
            full((e_all, 1)), full((1, e_all)), full((e_all, 1)),
            full((NUM_W, h, h)), full((NUM_V, h)),
        ],
        out_specs=(full((num_a, h)), full((num_b, h))),
        compiler_params=pltpu.CompilerParams(
            dimension_semantics=("arbitrary",),
            vmem_limit_bytes=16 * 1024 * 1024,   # tiny footprint; far under any gen's VMEM
        ),
    )(x_all, src_col, dst_row, ea_col, w_all, v_all)
    return {"ntA": out_a, "ntB": out_b}


# ----------------------------- parameters -----------------------------

def init_params(key):
    """Parameters mirroring the PyTorch HeteroGINE module (num_layers=1)."""
    keys = iter(jax.random.split(key, 64))

    def lin(fan_in, fan_out):
        w = jax.random.normal(next(keys), (fan_in, fan_out), jnp.float32) / math.sqrt(fan_in)
        b = 0.01 * jax.random.normal(next(keys), (1, fan_out), jnp.float32)
        return {"W": w, "b": b}

    def ln():
        return {"g": jnp.ones((1, HIDDEN), jnp.float32),
                "beta": jnp.zeros((1, HIDDEN), jnp.float32)}

    params = {"convs": {}, "post": {}}
    for et in EDGE_TYPES:
        params["convs"][et_key(et)] = {
            "edge_lin": lin(1, HIDDEN),                       # GINEConv edge_dim=1 projection
            "nn_lin1": lin(HIDDEN, HIDDEN), "nn_ln1": ln(),
            "nn_lin2": lin(HIDDEN, HIDDEN), "nn_ln2": ln(),
            "eps": 0.0,                                       # GINEConv default, train_eps=False
        }
    for nt in NODE_TYPES:
        params["post"][nt] = {"lin1": lin(HIDDEN, HIDDEN), "ln1": ln(),
                              "lin2": lin(HIDDEN, HIDDEN)}
    return params


def pack_params(params):
    """Pack all weights into two stacks so the fused kernel needs only 2 parameter DMAs.

    W_all[2*e + {0,1}]        : GINE nn lin1 / lin2 weights for edge type e
    W_all[4 + 2*t + {0,1}]    : post lin1 / lin2 weights for node type t
    V_all[8*e + {0..7}]       : edge_W, edge_b, nn_b1, nn_g1, nn_beta1, nn_b2, nn_g2, nn_beta2
    V_all[16 + 4*t + {0..3}]  : post_b1, post_g1, post_beta1, post_b2
    """
    w_rows, v_rows = [], []
    for et in EDGE_TYPES:
        c = params["convs"][et_key(et)]
        w_rows += [c["nn_lin1"]["W"], c["nn_lin2"]["W"]]
    for nt in NODE_TYPES:
        q = params["post"][nt]
        w_rows += [q["lin1"]["W"], q["lin2"]["W"]]
    for et in EDGE_TYPES:
        c = params["convs"][et_key(et)]
        v_rows += [c["edge_lin"]["W"], c["edge_lin"]["b"],
                   c["nn_lin1"]["b"], c["nn_ln1"]["g"], c["nn_ln1"]["beta"],
                   c["nn_lin2"]["b"], c["nn_ln2"]["g"], c["nn_ln2"]["beta"]]
    for nt in NODE_TYPES:
        q = params["post"][nt]
        v_rows += [q["lin1"]["b"], q["ln1"]["g"], q["ln1"]["beta"], q["lin2"]["b"]]
    w_all = jnp.stack(w_rows, axis=0)            # (8, H, H)
    v_all = jnp.concatenate(v_rows, axis=0)      # (24, H)
    return w_all, v_all


def pack_graph(x_dict, ei_dict, ea_dict):
    """Stack node features of all types into one slab and merge all edge types into a single
    edge set whose src/dst indices address slab rows (src as a column, dst as a row, so the
    kernel builds its one-hot gather/scatter masks without any in-kernel transposes)."""
    row_off, cur = {}, 0
    for nt in NODE_TYPES:
        row_off[nt] = cur
        cur += x_dict[nt].shape[0]
    x_all = jnp.concatenate([x_dict[nt] for nt in NODE_TYPES], axis=0)

    srcs, dsts, eas = [], [], []
    for et in EDGE_TYPES:
        s_t, _, d_t = et
        srcs.append(ei_dict[et][0] + row_off[s_t])
        dsts.append(ei_dict[et][1] + row_off[d_t])
        eas.append(ea_dict[et])
    src_col = jnp.concatenate(srcs).astype(jnp.int32).reshape(-1, 1)
    dst_row = jnp.concatenate(dsts).astype(jnp.int32).reshape(1, -1)
    ea_col = jnp.concatenate(eas, axis=0).astype(jnp.float32)
    e_split = int(ei_dict[EDGE_TYPES[0]].shape[1])   # first e_split merged edges = type 0
    return x_all, src_col, dst_row, ea_col, e_split


# ----------------------------- pure-JAX reference (self-check) -----------------------------

def reference_forward(params, x_dict, ei_dict, ea_dict):
    def ln_(y, p):
        mu = jnp.mean(y, axis=-1, keepdims=True)
        var = jnp.mean((y - mu) ** 2, axis=-1, keepdims=True)
        return (y - mu) * jax.lax.rsqrt(var + LN_EPS) * p["g"] + p["beta"]

    agg = {}
    for et in EDGE_TYPES:
        s_t, _, d_t = et
        c = params["convs"][et_key(et)]
        src, dst = ei_dict[et][0], ei_dict[et][1]
        e_proj = ea_dict[et] @ c["edge_lin"]["W"] + c["edge_lin"]["b"]
        msg = jnp.maximum(x_dict[s_t][src] + e_proj, 0.0)
        aggr = jax.ops.segment_sum(msg, dst, num_segments=x_dict[d_t].shape[0])
        h = (1.0 + c["eps"]) * x_dict[d_t] + aggr
        h = jnp.maximum(ln_(h @ c["nn_lin1"]["W"] + c["nn_lin1"]["b"], c["nn_ln1"]), 0.0)
        h = jnp.maximum(ln_(h @ c["nn_lin2"]["W"] + c["nn_lin2"]["b"], c["nn_ln2"]), 0.0)
        agg[d_t] = agg[d_t] + h if d_t in agg else h      # HeteroConv aggr='sum'
    out = {}
    for nt, h in agg.items():
        q = params["post"][nt]
        h = jnp.maximum(ln_(h @ q["lin1"]["W"] + q["lin1"]["b"], q["ln1"]), 0.0)
        out[nt] = jnp.maximum(h @ q["lin2"]["W"] + q["lin2"]["b"], 0.0)
    return out


# ----------------------------- main -----------------------------

if __name__ == "__main__":
    key = jax.random.PRNGKey(0)
    k_params, k_x, k_graph = jax.random.split(key, 3)

    params = init_params(k_params)
    w_all, v_all = pack_params(params)

    xk = jax.random.split(k_x, len(NODE_TYPES))
    x_dict = {nt: jax.random.normal(xk[i], (NUM_NODES[nt], HIDDEN), jnp.float32)
              for i, nt in enumerate(NODE_TYPES)}

    ei_dict, ea_dict = {}, {}
    gk = jax.random.split(k_graph, 3 * len(EDGE_TYPES))
    for i, et in enumerate(EDGE_TYPES):
        s_t, _, d_t = et
        src = jax.random.randint(gk[3 * i + 0], (NUM_EDGES,), 0, NUM_NODES[s_t], dtype=jnp.int32)
        dst = jax.random.randint(gk[3 * i + 1], (NUM_EDGES,), 0, NUM_NODES[d_t], dtype=jnp.int32)
        ei_dict[et] = jnp.stack([src, dst], axis=0)
        ea_dict[et] = jax.random.normal(gk[3 * i + 2], (NUM_EDGES, 1), jnp.float32)

    x_all, src_col, dst_row, ea_col, e_split = pack_graph(x_dict, ei_dict, ea_dict)

    fwd = jax.jit(hetero_gine_pallas, static_argnames=("num_a", "num_b", "e_split"))
    out = fwd(w_all, v_all, x_all, src_col, dst_row, ea_col,
              num_a=NUM_NODES["ntA"], num_b=NUM_NODES["ntB"], e_split=e_split)
    out = jax.block_until_ready(out)

    assert all(out[nt].shape == (NUM_NODES[nt], HIDDEN) for nt in NODE_TYPES)
    assert all(bool(jnp.all(jnp.isfinite(v))) for v in out.values()), "non-finite output"

    # loose tolerance: kernel uses TPU default (bf16-operand) MXU precision on the
    # gather/scatter/linear dots, the reference computes them exactly in f32.
    ref = reference_forward(params, x_dict, ei_dict, ea_dict)
    for nt in NODE_TYPES:
        err = float(jnp.max(jnp.abs(out[nt] - ref[nt])))
        assert err < 1e-1, f"mismatch for {nt}: max abs err {err}"

    print("KERNEL_OK")
</pallas_src>

<mosaic_0001>
module attributes {stable_mosaic.version = 11 : i64} {
  func.func @_hetero_gine_kernel(%arg0: i32, %arg1: memref<32x32xf32, #tpu.memory_space<vmem>>, %arg2: memref<48x1xi32, #tpu.memory_space<vmem>>, %arg3: memref<1x48xi32, #tpu.memory_space<vmem>>, %arg4: memref<48x1xf32, #tpu.memory_space<vmem>>, %arg5: memref<8x32x32xf32, #tpu.memory_space<vmem>>, %arg6: memref<24x32xf32, #tpu.memory_space<vmem>>, %arg7: memref<16x32xf32, #tpu.memory_space<vmem>>, %arg8: memref<16x32xf32, #tpu.memory_space<vmem>>) attributes {dimension_semantics = [#tpu.dimension_semantics<arbitrary>], iteration_bounds = array<i64: 1>, scalar_prefetch = 0 : i64, scratch_operands = 0 : i64, tpu.core_type = #tpu.core_type<tc>, window_params = [{pipeline_mode = #tpu.pipeline_mode<synchronous>, transform_indices = @transform_0, window_bounds = array<i64: 32, 32>}, {pipeline_mode = #tpu.pipeline_mode<synchronous>, transform_indices = @transform_1, window_bounds = array<i64: 48, 1>}, {pipeline_mode = #tpu.pipeline_mode<synchronous>, transform_indices = @transform_2, window_bounds = array<i64: 1, 48>}, {pipeline_mode = #tpu.pipeline_mode<synchronous>, transform_indices = @transform_3, window_bounds = array<i64: 48, 1>}, {pipeline_mode = #tpu.pipeline_mode<synchronous>, transform_indices = @transform_4, window_bounds = array<i64: 8, 32, 32>}, {pipeline_mode = #tpu.pipeline_mode<synchronous>, transform_indices = @transform_5, window_bounds = array<i64: 24, 32>}, {pipeline_mode = #tpu.pipeline_mode<synchronous>, transform_indices = @transform_6, window_bounds = array<i64: 16, 32>}, {pipeline_mode = #tpu.pipeline_mode<synchronous>, transform_indices = @transform_7, window_bounds = array<i64: 16, 32>}]} {
    %c0 = arith.constant 0 : index
    %c0_0 = arith.constant 0 : index
    %0 = vector.load %arg1[%c0, %c0_0] : memref<32x32xf32, #tpu.memory_space<vmem>>, vector<32x32xf32>
    %c0_1 = arith.constant 0 : index
    %c0_2 = arith.constant 0 : index
    %1 = vector.load %arg2[%c0_1, %c0_2] : memref<48x1xi32, #tpu.memory_space<vmem>>, vector<48x1xi32>
    %c0_3 = arith.constant 0 : index
    %c0_4 = arith.constant 0 : index
    %2 = vector.load %arg3[%c0_3, %c0_4] : memref<1x48xi32, #tpu.memory_space<vmem>>, vector<1x48xi32>
    %c0_5 = arith.constant 0 : index
    %c0_6 = arith.constant 0 : index
    %3 = vector.load %arg4[%c0_5, %c0_6] : memref<48x1xf32, #tpu.memory_space<vmem>>, vector<48x1xf32>
    %4 = tpu.iota {dimensions = array<i32: 0>} : vector<48x32xi32>
    %c24_i32 = arith.constant 24 : i32
    %5 = vector.broadcast %c24_i32 : i32 to vector<48x32xi32>
    %6 = arith.cmpi sge, %4, %5 : vector<48x32xi32>
    %c8 = arith.constant 8 : index
    %c0_7 = arith.constant 0 : index
    %7 = vector.load %arg6[%c8, %c0_7] : memref<24x32xf32, #tpu.memory_space<vmem>>, vector<1x32xf32>
    %c0_8 = arith.constant 0 : index
    %c0_9 = arith.constant 0 : index
    %8 = vector.load %arg6[%c0_8, %c0_9] : memref<24x32xf32, #tpu.memory_space<vmem>>, vector<1x32xf32>
    %9 = vector.shape_cast %7 : vector<1x32xf32> to vector<1x32xf32>
    %10 = vector.broadcast %9 : vector<1x32xf32> to vector<48x32xf32>
    %11 = vector.shape_cast %8 : vector<1x32xf32> to vector<1x32xf32>
    %12 = vector.broadcast %11 : vector<1x32xf32> to vector<48x32xf32>
    %13 = arith.select %6, %10, %12 : vector<48x32xi1>, vector<48x32xf32>
    %c9 = arith.constant 9 : index
    %c0_10 = arith.constant 0 : index
    %14 = vector.load %arg6[%c9, %c0_10] : memref<24x32xf32, #tpu.memory_space<vmem>>, vector<1x32xf32>
    %c1 = arith.constant 1 : index
    %c0_11 = arith.constant 0 : index
    %15 = vector.load %arg6[%c1, %c0_11] : memref<24x32xf32, #tpu.memory_space<vmem>>, vector<1x32xf32>
    %16 = vector.shape_cast %14 : vector<1x32xf32> to vector<1x32xf32>
    %17 = vector.broadcast %16 : vector<1x32xf32> to vector<48x32xf32>
    %18 = vector.shape_cast %15 : vector<1x32xf32> to vector<1x32xf32>
    %19 = vector.broadcast %18 : vector<1x32xf32> to vector<48x32xf32>
    %20 = arith.select %6, %17, %19 : vector<48x32xi1>, vector<48x32xf32>
    %21 = vector.broadcast %3 : vector<48x1xf32> to vector<48x32xf32>
    %22 = arith.mulf %21, %13 : vector<48x32xf32>
    %23 = arith.addf %22, %20 : vector<48x32xf32>
    %24 = tpu.iota {dimensions = array<i32: 1>} : vector<48x32xi32>
    %25 = vector.broadcast %1 : vector<48x1xi32> to vector<48x32xi32>
    %26 = arith.cmpi eq, %24, %25 : vector<48x32xi32>
    %27 = arith.extui %26 : vector<48x32xi1> to vector<48x32xi32>
    %28 = arith.sitofp %27 : vector<48x32xi32> to vector<48x32xf32>
    %cst = arith.constant dense<0.000000e+00> : vector<48x32xf32>
    %29 = tpu.matmul %28, %0, %cst {dimension_numbers = #tpu.dot_dimension_numbers<[1], [0], [0], [1], [0, 0, 1, 1], [], []>} : vector<48x32xf32>, vector<32x32xf32>, vector<48x32xf32> -> vector<48x32xf32>
    %30 = arith.addf %29, %23 : vector<48x32xf32>
    %cst_12 = arith.constant 0.000000e+00 : f32
    %31 = vector.broadcast %cst_12 : f32 to vector<48x32xf32>
    %32 = arith.maximumf %30, %31 : vector<48x32xf32>
    %33 = tpu.iota {dimensions = array<i32: 0>} : vector<32x48xi32>
    %34 = vector.broadcast %2 : vector<1x48xi32> to vector<32x48xi32>
    %35 = arith.cmpi eq, %33, %34 : vector<32x48xi32>
    %36 = arith.extui %35 : vector<32x48xi1> to vector<32x48xi32>
    %37 = arith.sitofp %36 : vector<32x48xi32> to vector<32x48xf32>
    %cst_13 = arith.constant dense<0.000000e+00> : vector<32x32xf32>
    %38 = tpu.matmul %37, %32, %cst_13 {dimension_numbers = #tpu.dot_dimension_numbers<[1], [0], [0], [1], [0, 0, 1, 1], [], []>} : vector<32x48xf32>, vector<48x32xf32>, vector<32x32xf32> -> vector<32x32xf32>
    %39 = arith.addf %0, %38 : vector<32x32xf32>
    %40 = vector.extract_strided_slice %39 {offsets = [0, 0], sizes = [16, 32], strides = [1, 1]} : vector<32x32xf32> to vector<16x32xf32>
    %c2 = arith.constant 2 : index
    %c0_14 = arith.constant 0 : index
    %c0_15 = arith.constant 0 : index
    %41 = vector.load %arg5[%c2, %c0_14, %c0_15] : memref<8x32x32xf32, #tpu.memory_space<vmem>>, vector<1x32x32xf32>
    %42 = vector.shape_cast %41 : vector<1x32x32xf32> to vector<32x32xf32>
    %cst_16 = arith.constant dense<0.000000e+00> : vector<16x32xf32>
    %43 = tpu.matmul %40, %42, %cst_16 {dimension_numbers = #tpu.dot_dimension_numbers<[1], [0], [0], [1], [0, 0, 1, 1], [], []>} : vector<16x32xf32>, vector<32x32xf32>, vector<16x32xf32> -> vector<16x32xf32>
    %c10 = arith.constant 10 : index
    %c0_17 = arith.constant 0 : index
    %44 = vector.load %arg6[%c10, %c0_17] : memref<24x32xf32, #tpu.memory_space<vmem>>, vector<1x32xf32>
    %45 = vector.broadcast %44 : vector<1x32xf32> to vector<16x32xf32>
    %46 = arith.addf %43, %45 : vector<16x32xf32>
    %cst_18 = arith.constant dense<0.000000e+00> : vector<16xf32>
    %47 = vector.multi_reduction <add>, %46, %cst_18 [1] : vector<16x32xf32> to vector<16xf32>
    %48 = vector.shape_cast %47 : vector<16xf32> to vector<16x1xf32>
    %cst_19 = arith.constant 3.200000e+01 : f32
    %49 = vector.broadcast %cst_19 : f32 to vector<16x1xf32>
    %50 = arith.divf %48, %49 : vector<16x1xf32>
    %51 = vector.broadcast %50 : vector<16x1xf32> to vector<16x32xf32>
    %52 = arith.subf %46, %51 : vector<16x32xf32>
    %53 = arith.mulf %52, %52 : vector<16x32xf32>
    %cst_20 = arith.constant dense<0.000000e+00> : vector<16xf32>
    %54 = vector.multi_reduction <add>, %53, %cst_20 [1] : vector<16x32xf32> to vector<16xf32>
    %55 = vector.shape_cast %54 : vector<16xf32> to vector<16x1xf32>
    %cst_21 = arith.constant 3.200000e+01 : f32
    %56 = vector.broadcast %cst_21 : f32 to vector<16x1xf32>
    %57 = arith.divf %55, %56 : vector<16x1xf32>
    %58 = vector.broadcast %50 : vector<16x1xf32> to vector<16x32xf32>
    %59 = arith.subf %46, %58 : vector<16x32xf32>
    %cst_22 = arith.constant 9.99999974E-6 : f32
    %60 = vector.broadcast %cst_22 : f32 to vector<16x1xf32>
    %61 = arith.addf %57, %60 : vector<16x1xf32>
    %62 = math.rsqrt %61 : vector<16x1xf32>
    %63 = vector.broadcast %62 : vector<16x1xf32> to vector<16x32xf32>
    %64 = arith.mulf %59, %63 : vector<16x32xf32>
    %c11 = arith.constant 11 : index
    %c0_23 = arith.constant 0 : index
    %65 = vector.load %arg6[%c11, %c0_23] : memref<24x32xf32, #tpu.memory_space<vmem>>, vector<1x32xf32>
    %66 = vector.broadcast %65 : vector<1x32xf32> to vector<16x32xf32>
    %67 = arith.mulf %64, %66 : vector<16x32xf32>
    %c12 = arith.constant 12 : index
    %c0_24 = arith.constant 0 : index
    %68 = vector.load %arg6[%c12, %c0_24] : memref<24x32xf32, #tpu.memory_space<vmem>>, vector<1x32xf32>
    %69 = vector.broadcast %68 : vector<1x32xf32> to vector<16x32xf32>
    %70 = arith.addf %67, %69 : vector<16x32xf32>
    %cst_25 = arith.constant 0.000000e+00 : f32
    %71 = vector.broadcast %cst_25 : f32 to vector<16x32xf32>
    %72 = arith.maximumf %70, %71 : vector<16x32xf32>
    %c3 = arith.constant 3 : index
    %c0_26 = arith.constant 0 : index
    %c0_27 = arith.constant 0 : index
    %73 = vector.load %arg5[%c3, %c0_26, %c0_27] : memref<8x32x32xf32, #tpu.memory_space<vmem>>, vector<1x32x32xf32>
    %74 = vector.shape_cast %73 : vector<1x32x32xf32> to vector<32x32xf32>
    %cst_28 = arith.constant dense<0.000000e+00> : vector<16x32xf32>
    %75 = tpu.matmul %72, %74, %cst_28 {dimension_numbers = #tpu.dot_dimension_numbers<[1], [0], [0], [1], [0, 0, 1, 1], [], []>} : vector<16x32xf32>, vector<32x32xf32>, vector<16x32xf32> -> vector<16x32xf32>
    %c13 = arith.constant 13 : index
    %c0_29 = arith.constant 0 : index
    %76 = vector.load %arg6[%c13, %c0_29] : memref<24x32xf32, #tpu.memory_space<vmem>>, vector<1x32xf32>
    %77 = vector.broadcast %76 : vector<1x32xf32> to vector<16x32xf32>
    %78 = arith.addf %75, %77 : vector<16x32xf32>
    %cst_30 = arith.constant dense<0.000000e+00> : vector<16xf32>
    %79 = vector.multi_reduction <add>, %78, %cst_30 [1] : vector<16x32xf32> to vector<16xf32>
    %80 = vector.shape_cast %79 : vector<16xf32> to vector<16x1xf32>
    %cst_31 = arith.constant 3.200000e+01 : f32
    %81 = vector.broadcast %cst_31 : f32 to vector<16x1xf32>
    %82 = arith.divf %80, %81 : vector<16x1xf32>
    %83 = vector.broadcast %82 : vector<16x1xf32> to vector<16x32xf32>
    %84 = arith.subf %78, %83 : vector<16x32xf32>
    %85 = arith.mulf %84, %84 : vector<16x32xf32>
    %cst_32 = arith.constant dense<0.000000e+00> : vector<16xf32>
    %86 = vector.multi_reduction <add>, %85, %cst_32 [1] : vector<16x32xf32> to vector<16xf32>
    %87 = vector.shape_cast %86 : vector<16xf32> to vector<16x1xf32>
    %cst_33 = arith.constant 3.200000e+01 : f32
    %88 = vector.broadcast %cst_33 : f32 to vector<16x1xf32>
    %89 = arith.divf %87, %88 : vector<16x1xf32>
    %90 = vector.broadcast %82 : vector<16x1xf32> to vector<16x32xf32>
    %91 = arith.subf %78, %90 : vector<16x32xf32>
    %cst_34 = arith.constant 9.99999974E-6 : f32
    %92 = vector.broadcast %cst_34 : f32 to vector<16x1xf32>
    %93 = arith.addf %89, %92 : vector<16x1xf32>
    %94 = math.rsqrt %93 : vector<16x1xf32>
    %95 = vector.broadcast %94 : vector<16x1xf32> to vector<16x32xf32>
    %96 = arith.mulf %91, %95 : vector<16x32xf32>
    %c14 = arith.constant 14 : index
    %c0_35 = arith.constant 0 : index
    %97 = vector.load %arg6[%c14, %c0_35] : memref<24x32xf32, #tpu.memory_space<vmem>>, vector<1x32xf32>
    %98 = vector.broadcast %97 : vector<1x32xf32> to vector<16x32xf32>
    %99 = arith.mulf %96, %98 : vector<16x32xf32>
    %c15 = arith.constant 15 : index
    %c0_36 = arith.constant 0 : index
    %100 = vector.load %arg6[%c15, %c0_36] : memref<24x32xf32, #tpu.memory_space<vmem>>, vector<1x32xf32>
    %101 = vector.broadcast %100 : vector<1x32xf32> to vector<16x32xf32>
    %102 = arith.addf %99, %101 : vector<16x32xf32>
    %cst_37 = arith.constant 0.000000e+00 : f32
    %103 = vector.broadcast %cst_37 : f32 to vector<16x32xf32>
    %104 = arith.maximumf %102, %103 : vector<16x32xf32>
    %105 = vector.extract_strided_slice %39 {offsets = [16, 0], sizes = [16, 32], strides = [1, 1]} : vector<32x32xf32> to vector<16x32xf32>
    %c0_38 = arith.constant 0 : index
    %c0_39 = arith.constant 0 : index
    %c0_40 = arith.constant 0 : index
    %106 = vector.load %arg5[%c0_38, %c0_39, %c0_40] : memref<8x32x32xf32, #tpu.memory_space<vmem>>, vector<1x32x32xf32>
    %107 = vector.shape_cast %106 : vector<1x32x32xf32> to vector<32x32xf32>
    %cst_41 = arith.constant dense<0.000000e+00> : vector<16x32xf32>
    %108 = tpu.matmul %105, %107, %cst_41 {dimension_numbers = #tpu.dot_dimension_numbers<[1], [0], [0], [1], [0, 0, 1, 1], [], []>} : vector<16x32xf32>, vector<32x32xf32>, vector<16x32xf32> -> vector<16x32xf32>
    %c2_42 = arith.constant 2 : index
    %c0_43 = arith.constant 0 : index
    %109 = vector.load %arg6[%c2_42, %c0_43] : memref<24x32xf32, #tpu.memory_space<vmem>>, vector<1x32xf32>
    %110 = vector.broadcast %109 : vector<1x32xf32> to vector<16x32xf32>
    %111 = arith.addf %108, %110 : vector<16x32xf32>
    %cst_44 = arith.constant dense<0.000000e+00> : vector<16xf32>
    %112 = vector.multi_reduction <add>, %111, %cst_44 [1] : vector<16x32xf32> to vector<16xf32>
    %113 = vector.shape_cast %112 : vector<16xf32> to vector<16x1xf32>
    %cst_45 = arith.constant 3.200000e+01 : f32
    %114 = vector.broadcast %cst_45 : f32 to vector<16x1xf32>
    %115 = arith.divf %113, %114 : vector<16x1xf32>
    %116 = vector.broadcast %115 : vector<16x1xf32> to vector<16x32xf32>
    %117 = arith.subf %111, %116 : vector<16x32xf32>
    %118 = arith.mulf %117, %117 : vector<16x32xf32>
    %cst_46 = arith.constant dense<0.000000e+00> : vector<16xf32>
    %119 = vector.multi_reduction <add>, %118, %cst_46 [1] : vector<16x32xf32> to vector<16xf32>
    %120 = vector.shape_cast %119 : vector<16xf32> to vector<16x1xf32>
    %cst_47 = arith.constant 3.200000e+01 : f32
    %121 = vector.broadcast %cst_47 : f32 to vector<16x1xf32>
    %122 = arith.divf %120, %121 : vector<16x1xf32>
    %123 = vector.broadcast %115 : vector<16x1xf32> to vector<16x32xf32>
    %124 = arith.subf %111, %123 : vector<16x32xf32>
    %cst_48 = arith.constant 9.99999974E-6 : f32
    %125 = vector.broadcast %cst_48 : f32 to vector<16x1xf32>
    %126 = arith.addf %122, %125 : vector<16x1xf32>
    %127 = math.rsqrt %126 : vector<16x1xf32>
    %128 = vector.broadcast %127 : vector<16x1xf32> to vector<16x32xf32>
    %129 = arith.mulf %124, %128 : vector<16x32xf32>
    %c3_49 = arith.constant 3 : index
    %c0_50 = arith.constant 0 : index
    %130 = vector.load %arg6[%c3_49, %c0_50] : memref<24x32xf32, #tpu.memory_space<vmem>>, vector<1x32xf32>
    %131 = vector.broadcast %130 : vector<1x32xf32> to vector<16x32xf32>
    %132 = arith.mulf %129, %131 : vector<16x32xf32>
    %c4 = arith.constant 4 : index
    %c0_51 = arith.constant 0 : index
    %133 = vector.load %arg6[%c4, %c0_51] : memref<24x32xf32, #tpu.memory_space<vmem>>, vector<1x32xf32>
    %134 = vector.broadcast %133 : vector<1x32xf32> to vector<16x32xf32>
    %135 = arith.addf %132, %134 : vector<16x32xf32>
    %cst_52 = arith.constant 0.000000e+00 : f32
    %136 = vector.broadcast %cst_52 : f32 to vector<16x32xf32>
    %137 = arith.maximumf %135, %136 : vector<16x32xf32>
    %c1_53 = arith.constant 1 : index
    %c0_54 = arith.constant 0 : index
    %c0_55 = arith.constant 0 : index
    %138 = vector.load %arg5[%c1_53, %c0_54, %c0_55] : memref<8x32x32xf32, #tpu.memory_space<vmem>>, vector<1x32x32xf32>
    %139 = vector.shape_cast %138 : vector<1x32x32xf32> to vector<32x32xf32>
    %cst_56 = arith.constant dense<0.000000e+00> : vector<16x32xf32>
    %140 = tpu.matmul %137, %139, %cst_56 {dimension_numbers = #tpu.dot_dimension_numbers<[1], [0], [0], [1], [0, 0, 1, 1], [], []>} : vector<16x32xf32>, vector<32x32xf32>, vector<16x32xf32> -> vector<16x32xf32>
    %c5 = arith.constant 5 : index
    %c0_57 = arith.constant 0 : index
    %141 = vector.load %arg6[%c5, %c0_57] : memref<24x32xf32, #tpu.memory_space<vmem>>, vector<1x32xf32>
    %142 = vector.broadcast %141 : vector<1x32xf32> to vector<16x32xf32>
    %143 = arith.addf %140, %142 : vector<16x32xf32>
    %cst_58 = arith.constant dense<0.000000e+00> : vector<16xf32>
    %144 = vector.multi_reduction <add>, %143, %cst_58 [1] : vector<16x32xf32> to vector<16xf32>
    %145 = vector.shape_cast %144 : vector<16xf32> to vector<16x1xf32>
    %cst_59 = arith.constant 3.200000e+01 : f32
    %146 = vector.broadcast %cst_59 : f32 to vector<16x1xf32>
    %147 = arith.divf %145, %146 : vector<16x1xf32>
    %148 = vector.broadcast %147 : vector<16x1xf32> to vector<16x32xf32>
    %149 = arith.subf %143, %148 : vector<16x32xf32>
    %150 = arith.mulf %149, %149 : vector<16x32xf32>
    %cst_60 = arith.constant dense<0.000000e+00> : vector<16xf32>
    %151 = vector.multi_reduction <add>, %150, %cst_60 [1] : vector<16x32xf32> to vector<16xf32>
    %152 = vector.shape_cast %151 : vector<16xf32> to vector<16x1xf32>
    %cst_61 = arith.constant 3.200000e+01 : f32
    %153 = vector.broadcast %cst_61 : f32 to vector<16x1xf32>
    %154 = arith.divf %152, %153 : vector<16x1xf32>
    %155 = vector.broadcast %147 : vector<16x1xf32> to vector<16x32xf32>
    %156 = arith.subf %143, %155 : vector<16x32xf32>
    %cst_62 = arith.constant 9.99999974E-6 : f32
    %157 = vector.broadcast %cst_62 : f32 to vector<16x1xf32>
    %158 = arith.addf %154, %157 : vector<16x1xf32>
    %159 = math.rsqrt %158 : vector<16x1xf32>
    %160 = vector.broadcast %159 : vector<16x1xf32> to vector<16x32xf32>
    %161 = arith.mulf %156, %160 : vector<16x32xf32>
    %c6 = arith.constant 6 : index
    %c0_63 = arith.constant 0 : index
    %162 = vector.load %arg6[%c6, %c0_63] : memref<24x32xf32, #tpu.memory_space<vmem>>, vector<1x32xf32>
    %163 = vector.broadcast %162 : vector<1x32xf32> to vector<16x32xf32>
    %164 = arith.mulf %161, %163 : vector<16x32xf32>
    %c7 = arith.constant 7 : index
    %c0_64 = arith.constant 0 : index
    %165 = vector.load %arg6[%c7, %c0_64] : memref<24x32xf32, #tpu.memory_space<vmem>>, vector<1x32xf32>
    %166 = vector.broadcast %165 : vector<1x32xf32> to vector<16x32xf32>
    %167 = arith.addf %164, %166 : vector<16x32xf32>
    %cst_65 = arith.constant 0.000000e+00 : f32
    %168 = vector.broadcast %cst_65 : f32 to vector<16x32xf32>
    %169 = arith.maximumf %167, %168 : vector<16x32xf32>
    %c4_66 = arith.constant 4 : index
    %c0_67 = arith.constant 0 : index
    %c0_68 = arith.constant 0 : index
    %170 = vector.load %arg5[%c4_66, %c0_67, %c0_68] : memref<8x32x32xf32, #tpu.memory_space<vmem>>, vector<1x32x32xf32>
    %171 = vector.shape_cast %170 : vector<1x32x32xf32> to vector<32x32xf32>
    %cst_69 = arith.constant dense<0.000000e+00> : vector<16x32xf32>
    %172 = tpu.matmul %104, %171, %cst_69 {dimension_numbers = #tpu.dot_dimension_numbers<[1], [0], [0], [1], [0, 0, 1, 1], [], []>} : vector<16x32xf32>, vector<32x32xf32>, vector<16x32xf32> -> vector<16x32xf32>
    %c16 = arith.constant 16 : index
    %c0_70 = arith.constant 0 : index
    %173 = vector.load %arg6[%c16, %c0_70] : memref<24x32xf32, #tpu.memory_space<vmem>>, vector<1x32xf32>
    %174 = vector.broadcast %173 : vector<1x32xf32> to vector<16x32xf32>
    %175 = arith.addf %172, %174 : vector<16x32xf32>
    %cst_71 = arith.constant dense<0.000000e+00> : vector<16xf32>
    %176 = vector.multi_reduction <add>, %175, %cst_71 [1] : vector<16x32xf32> to vector<16xf32>
    %177 = vector.shape_cast %176 : vector<16xf32> to vector<16x1xf32>
    %cst_72 = arith.constant 3.200000e+01 : f32
    %178 = vector.broadcast %cst_72 : f32 to vector<16x1xf32>
    %179 = arith.divf %177, %178 : vector<16x1xf32>
    %180 = vector.broadcast %179 : vector<16x1xf32> to vector<16x32xf32>
    %181 = arith.subf %175, %180 : vector<16x32xf32>
    %182 = arith.mulf %181, %181 : vector<16x32xf32>
    %cst_73 = arith.constant dense<0.000000e+00> : vector<16xf32>
    %183 = vector.multi_reduction <add>, %182, %cst_73 [1] : vector<16x32xf32> to vector<16xf32>
    %184 = vector.shape_cast %183 : vector<16xf32> to vector<16x1xf32>
    %cst_74 = arith.constant 3.200000e+01 : f32
    %185 = vector.broadcast %cst_74 : f32 to vector<16x1xf32>
    %186 = arith.divf %184, %185 : vector<16x1xf32>
    %187 = vector.broadcast %179 : vector<16x1xf32> to vector<16x32xf32>
    %188 = arith.subf %175, %187 : vector<16x32xf32>
    %cst_75 = arith.constant 9.99999974E-6 : f32
    %189 = vector.broadcast %cst_75 : f32 to vector<16x1xf32>
    %190 = arith.addf %186, %189 : vector<16x1xf32>
    %191 = math.rsqrt %190 : vector<16x1xf32>
    %192 = vector.broadcast %191 : vector<16x1xf32> to vector<16x32xf32>
    %193 = arith.mulf %188, %192 : vector<16x32xf32>
    %c17 = arith.constant 17 : index
    %c0_76 = arith.constant 0 : index
    %194 = vector.load %arg6[%c17, %c0_76] : memref<24x32xf32, #tpu.memory_space<vmem>>, vector<1x32xf32>
    %195 = vector.broadcast %194 : vector<1x32xf32> to vector<16x32xf32>
    %196 = arith.mulf %193, %195 : vector<16x32xf32>
    %c18 = arith.constant 18 : index
    %c0_77 = arith.constant 0 : index
    %197 = vector.load %arg6[%c18, %c0_77] : memref<24x32xf32, #tpu.memory_space<vmem>>, vector<1x32xf32>
    %198 = vector.broadcast %197 : vector<1x32xf32> to vector<16x32xf32>
    %199 = arith.addf %196, %198 : vector<16x32xf32>
    %cst_78 = arith.constant 0.000000e+00 : f32
    %200 = vector.broadcast %cst_78 : f32 to vector<16x32xf32>
    %201 = arith.maximumf %199, %200 : vector<16x32xf32>
    %c5_79 = arith.constant 5 : index
    %c0_80 = arith.constant 0 : index
    %c0_81 = arith.constant 0 : index
    %202 = vector.load %arg5[%c5_79, %c0_80, %c0_81] : memref<8x32x32xf32, #tpu.memory_space<vmem>>, vector<1x32x32xf32>
    %203 = vector.shape_cast %202 : vector<1x32x32xf32> to vector<32x32xf32>
    %cst_82 = arith.constant dense<0.000000e+00> : vector<16x32xf32>
    %204 = tpu.matmul %201, %203, %cst_82 {dimension_numbers = #tpu.dot_dimension_numbers<[1], [0], [0], [1], [0, 0, 1, 1], [], []>} : vector<16x32xf32>, vector<32x32xf32>, vector<16x32xf32> -> vector<16x32xf32>
    %c19 = arith.constant 19 : index
    %c0_83 = arith.constant 0 : index
    %205 = vector.load %arg6[%c19, %c0_83] : memref<24x32xf32, #tpu.memory_space<vmem>>, vector<1x32xf32>
    %206 = vector.broadcast %205 : vector<1x32xf32> to vector<16x32xf32>
    %207 = arith.addf %204, %206 : vector<16x32xf32>
    %cst_84 = arith.constant 0.000000e+00 : f32
    %208 = vector.broadcast %cst_84 : f32 to vector<16x32xf32>
    %209 = arith.maximumf %207, %208 : vector<16x32xf32>
    %c0_85 = arith.constant 0 : index
    %c0_86 = arith.constant 0 : index
    %210 = vector.load %arg7[%c0_85, %c0_86] : memref<16x32xf32, #tpu.memory_space<vmem>>, vector<16x32xf32>
    tpu.vector_store %arg7[%c0_85, %c0_86], %209 {strides = array<i32>} : memref<16x32xf32, #tpu.memory_space<vmem>>, vector<16x32xf32>,
    %c6_87 = arith.constant 6 : index
    %c0_88 = arith.constant 0 : index
    %c0_89 = arith.constant 0 : index
    %211 = vector.load %arg5[%c6_87, %c0_88, %c0_89] : memref<8x32x32xf32, #tpu.memory_space<vmem>>, vector<1x32x32xf32>
    %212 = vector.shape_cast %211 : vector<1x32x32xf32> to vector<32x32xf32>
    %cst_90 = arith.constant dense<0.000000e+00> : vector<16x32xf32>
    %213 = tpu.matmul %169, %212, %cst_90 {dimension_numbers = #tpu.dot_dimension_numbers<[1], [0], [0], [1], [0, 0, 1, 1], [], []>} : vector<16x32xf32>, vector<32x32xf32>, vector<16x32xf32> -> vector<16x32xf32>
    %c20 = arith.constant 20 : index
    %c0_91 = arith.constant 0 : index
    %214 = vector.load %arg6[%c20, %c0_91] : memref<24x32xf32, #tpu.memory_space<vmem>>, vector<1x32xf32>
    %215 = vector.broadcast %214 : vector<1x32xf32> to vector<16x32xf32>
    %216 = arith.addf %213, %215 : vector<16x32xf32>
    %cst_92 = arith.constant dense<0.000000e+00> : vector<16xf32>
    %217 = vector.multi_reduction <add>, %216, %cst_92 [1] : vector<16x32xf32> to vector<16xf32>
    %218 = vector.shape_cast %217 : vector<16xf32> to vector<16x1xf32>
    %cst_93 = arith.constant 3.200000e+01 : f32
    %219 = vector.broadcast %cst_93 : f32 to vector<16x1xf32>
    %220 = arith.divf %218, %219 : vector<16x1xf32>
    %221 = vector.broadcast %220 : vector<16x1xf32> to vector<16x32xf32>
    %222 = arith.subf %216, %221 : vector<16x32xf32>
    %223 = arith.mulf %222, %222 : vector<16x32xf32>
    %cst_94 = arith.constant dense<0.000000e+00> : vector<16xf32>
    %224 = vector.multi_reduction <add>, %223, %cst_94 [1] : vector<16x32xf32> to vector<16xf32>
    %225 = vector.shape_cast %224 : vector<16xf32> to vector<16x1xf32>
    %cst_95 = arith.constant 3.200000e+01 : f32
    %226 = vector.broadcast %cst_95 : f32 to vector<16x1xf32>
    %227 = arith.divf %225, %226 : vector<16x1xf32>
    %228 = vector.broadcast %220 : vector<16x1xf32> to vector<16x32xf32>
    %229 = arith.subf %216, %228 : vector<16x32xf32>
    %cst_96 = arith.constant 9.99999974E-6 : f32
    %230 = vector.broadcast %cst_96 : f32 to vector<16x1xf32>
    %231 = arith.addf %227, %230 : vector<16x1xf32>
    %232 = math.rsqrt %231 : vector<16x1xf32>
    %233 = vector.broadcast %232 : vector<16x1xf32> to vector<16x32xf32>
    %234 = arith.mulf %229, %233 : vector<16x32xf32>
    %c21 = arith.constant 21 : index
    %c0_97 = arith.constant 0 : index
    %235 = vector.load %arg6[%c21, %c0_97] : memref<24x32xf32, #tpu.memory_space<vmem>>, vector<1x32xf32>
    %236 = vector.broadcast %235 : vector<1x32xf32> to vector<16x32xf32>
    %237 = arith.mulf %234, %236 : vector<16x32xf32>
    %c22 = arith.constant 22 : index
    %c0_98 = arith.constant 0 : index
    %238 = vector.load %arg6[%c22, %c0_98] : memref<24x32xf32, #tpu.memory_space<vmem>>, vector<1x32xf32>
    %239 = vector.broadcast %238 : vector<1x32xf32> to vector<16x32xf32>
    %240 = arith.addf %237, %239 : vector<16x32xf32>
    %cst_99 = arith.constant 0.000000e+00 : f32
    %241 = vector.broadcast %cst_99 : f32 to vector<16x32xf32>
    %242 = arith.maximumf %240, %241 : vector<16x32xf32>
    %c7_100 = arith.constant 7 : index
    %c0_101 = arith.constant 0 : index
    %c0_102 = arith.constant 0 : index
    %243 = vector.load %arg5[%c7_100, %c0_101, %c0_102] : memref<8x32x32xf32, #tpu.memory_space<vmem>>, vector<1x32x32xf32>
    %244 = vector.shape_cast %243 : vector<1x32x32xf32> to vector<32x32xf32>
    %cst_103 = arith.constant dense<0.000000e+00> : vector<16x32xf32>
    %245 = tpu.matmul %242, %244, %cst_103 {dimension_numbers = #tpu.dot_dimension_numbers<[1], [0], [0], [1], [0, 0, 1, 1], [], []>} : vector<16x32xf32>, vector<32x32xf32>, vector<16x32xf32> -> vector<16x32xf32>
    %c23 = arith.constant 23 : index
    %c0_104 = arith.constant 0 : index
    %246 = vector.load %arg6[%c23, %c0_104] : memref<24x32xf32, #tpu.memory_space<vmem>>, vector<1x32xf32>
    %247 = vector.broadcast %246 : vector<1x32xf32> to vector<16x32xf32>
    %248 = arith.addf %245, %247 : vector<16x32xf32>
    %cst_105 = arith.constant 0.000000e+00 : f32
    %249 = vector.broadcast %cst_105 : f32 to vector<16x32xf32>
    %250 = arith.maximumf %248, %249 : vector<16x32xf32>
    %c0_106 = arith.constant 0 : index
    %c0_107 = arith.constant 0 : index
    %251 = vector.load %arg8[%c0_106, %c0_107] : memref<16x32xf32, #tpu.memory_space<vmem>>, vector<16x32xf32>
    tpu.vector_store %arg8[%c0_106, %c0_107], %250 {strides = array<i32>} : memref<16x32xf32, #tpu.memory_space<vmem>>, vector<16x32xf32>,
    return
  }
  func.func @transform_0(%arg0: i32) -> (i32, i32) {
    %c0_i32 = arith.constant 0 : i32
    %c0_i32_0 = arith.constant 0 : i32
    %c0_i32_1 = arith.constant 0 : i32
    return %c0_i32, %c0_i32_0 : i32, i32
  }
  func.func @transform_1(%arg0: i32) -> (i32, i32) {
    %c0_i32 = arith.constant 0 : i32
    %c0_i32_0 = arith.constant 0 : i32
    %c0_i32_1 = arith.constant 0 : i32
    return %c0_i32, %c0_i32_0 : i32, i32
  }
  func.func @transform_2(%arg0: i32) -> (i32, i32) {
    %c0_i32 = arith.constant 0 : i32
    %c0_i32_0 = arith.constant 0 : i32
    %c0_i32_1 = arith.constant 0 : i32
    return %c0_i32, %c0_i32_0 : i32, i32
  }
  func.func @transform_3(%arg0: i32) -> (i32, i32) {
    %c0_i32 = arith.constant 0 : i32
    %c0_i32_0 = arith.constant 0 : i32
    %c0_i32_1 = arith.constant 0 : i32
    return %c0_i32, %c0_i32_0 : i32, i32
  }
  func.func @transform_4(%arg0: i32) -> (i32, i32, i32) {
    %c0_i32 = arith.constant 0 : i32
    %c0_i32_0 = arith.constant 0 : i32
    %c0_i32_1 = arith.constant 0 : i32
    %c0_i32_2 = arith.constant 0 : i32
    return %c0_i32, %c0_i32_0, %c0_i32_1 : i32, i32, i32
  }
  func.func @transform_5(%arg0: i32) -> (i32, i32) {
    %c0_i32 = arith.constant 0 : i32
    %c0_i32_0 = arith.constant 0 : i32
    %c0_i32_1 = arith.constant 0 : i32
    return %c0_i32, %c0_i32_0 : i32, i32
  }
  func.func @transform_6(%arg0: i32) -> (i32, i32) {
    %c0_i32 = arith.constant 0 : i32
    %c0_i32_0 = arith.constant 0 : i32
    %c0_i32_1 = arith.constant 0 : i32
    return %c0_i32, %c0_i32_0 : i32, i32
  }
  func.func @transform_7(%arg0: i32) -> (i32, i32) {
    %c0_i32 = arith.constant 0 : i32
    %c0_i32_0 = arith.constant 0 : i32
    %c0_i32_1 = arith.constant 0 : i32
    return %c0_i32, %c0_i32_0 : i32, i32
  }
}

</mosaic_0001>

<bundles_post_ra>
// kernel: hetero_gine_pallas.1
= control target key start
LH: loop header
LB: loop body
LE: loop exit
PB: predicated region body
PF: predicated region fallthrough
CT: control target
= control target key end

     0   :  { %13 = vsyncpa [#allocation3], 0  ;;  %s1490_s0 = inlined_call_operand.vmem [shape: f32[32,32], index: 0, kind: input, shape index: {}]   ;;  %s1491_s1 = inlined_call_operand.vmem [shape: s32[48,1], index: 1, kind: input, shape index: {}]   ;;  %s1492_s2 = inlined_call_operand.vmem [shape: s32[1,48], index: 2, kind: input, shape index: {}]   ;;  %s1493_s3 = inlined_call_operand.vmem [shape: f32[48,1], index: 3, kind: input, shape index: {}]   ;;  %s1494_s4 = inlined_call_operand.hbm [shape: f32[8,32,32], index: 4, kind: input, shape index: {}]   ;;  %s1495_s5 = inlined_call_operand.vmem [shape: f32[24,32], index: 5, kind: input, shape index: {}]   ;;  %s1496_s6 = inlined_call_operand.hbm [shape: f32[16,32], index: 6, kind: output, shape index: {0}]   ;;  %s1497_s7 = inlined_call_operand.hbm [shape: f32[16,32], index: 7, kind: output, shape index: {1}]  }
   0x1   :  { %14 = vsyncpa [#allocation4], 0 }
   0x2   :  { %15 = vsyncpa [#allocation7], 0  ;;  %s28_s26 = sshll.u32 %s1494_s4, 4  ;;  %s1135_s27 = smov [#allocation2]   ;;  %s29_s26 = int_to_ptr.hbm [resolvable:$true] %s28_s26 }
   0x3   :  { %s30_s28 = sshll.u32 %s1135_s27, 4  ;;  %s1136_s29 = smov 128   ;;  %s31_s28 = int_to_ptr.vmem [resolvable:$true] %s30_s28 }
   0x4   :  { %s1137_s30 = smov 8  }
   0x5   :  { %36 = dma.hbm_to_vmem [thread:$0]  %s29_s26, 4096, %s31_s28, [#allocation3], %s1136_s29, %s1136_s29, %s1137_s30  }
   0x6   :  { %1129 = dma.done.wait [#allocation3], 4096  }
   0x7   :  { %1130 = vsyncadd [#allocation3], 4294963200  ;;  %v1138_v0 = vmov 0   ;;  %v52_v1 = vld [vmem:[%s1491_s1 + $0x28] sm:$0xff]  ;;  %v49_v2 = vld [vmem:[%s1491_s1 + $0x10] sm:$0xff]  ;;  %v60_v17 = vlaneseq  ;;  %vm173_vm0 = vcmask 261120  }
   0x8   :  { %1005 = vset.pattern.permute.xlu2 %v1138_v0  ;;  %1004 = vset.pattern.permute.xlu1 %v1138_v0  ;;  %v47_v3 = vld [vmem:[%s1491_s1] sm:$0xff]  ;;  %v50_v4 = vld [vmem:[%s1491_s1 + $0x18] sm:$0xff]  ;;  %v1212_v7 = vld [vmem:[%s1490_s0 + $0x10] sm:$0xff]  ;;  %v1139_v20 = vmov 0.0   ;;  %vm246_vm8 = vcmask 392192   ;;  %s1141_s14 = smov [#allocation5]  }
   0x9   :  { %1003 = vset.pattern.permute.xlu0 %v1138_v0  ;;  %153 = vperm.xlu2 %1005, %v52_v1   ;;  %v51_v5 = vld [vmem:[%s1491_s1 + $0x20] sm:$0xff]  ;;  %v1207_v6 = vld [vmem:[%s1490_s0 + $0x18] sm:$0xff]  ;;  %v48_v8 = vld [vmem:[%s1491_s1 + $0x8] sm:$0xff]  ;;  %v136_v18 = vand.u32 127, %v60_v17  ;;  %v61_v1 = vshrl.u32 %v60_v17, 7  ;;  %s922_s15 = sshll.u32 %s1141_s14, 4  ;;  %s923_s15 = int_to_ptr.vmem [resolvable:$true] %s922_s15 }
   0xa   :  { %144 = vperm.xlu1 %1004, %v49_v2   ;;  %138 = vperm.xlu0 %1003, %v47_v3   ;;  %v58_v9 = vld [vmem:[%s1493_s3 + $0x20] sm:$0xff]  ;;  %v57_v10 = vld [vmem:[%s1493_s3 + $0x18] sm:$0xff]  ;;  %v59_v11 = vld [vmem:[%s1493_s3 + $0x28] sm:$0xff]  ;;  %s924_s16 = sshll.u32 %s1496_s6, 4  ;;  %s937_s20 = sshll.u32 %s1497_s7, 4  ;;  %s925_s16 = int_to_ptr.hbm [resolvable:$true] %s924_s16  ;;  %s938_s20 = int_to_ptr.hbm [resolvable:$true] %s937_s20 }
   0xb   :  { %991 = vmatpush.msra.mxu2 %v1207_v6  ;;  %204 = vmatpush.msra.mxu0 %v1207_v6  ;;  %v55_v12 = vld [vmem:[%s1493_s3 + $0x8] sm:$0xff]  ;;  %v54_v13 = vld [vmem:[%s1493_s3] sm:$0xff]  ;;  %v56_v14 = vld [vmem:[%s1493_s3 + $0x10] sm:$0xff] }
   0xc   :  { %v1242_v15 = vld [vmem:[%s1490_s0 + $0x8] sm:$0xff]  ;;  %v1249_v16 = vld [vmem:[%s1490_s0] sm:$0xff] }
   0xd   :  { %992 = vmatpush.msra.mxu2 %v1212_v7  ;;  %205 = vmatpush.msra.mxu0 %v1212_v7  ;;  %v1006_v32 = vld [vmem:[%s1495_s5 + $0x8] ss:$0 sm:$0xff]  ;;  %v1008_v35 = vld [vmem:[%s1495_s5 + $0x9] ss:$0 sm:$0xff]  ;;  %v1007_v46 = vld [vmem:[%s1495_s5] ss:$0 sm:$0xff] }
   0xe   :  { %v1009_v52 = vld [vmem:[%s1495_s5 + $0x1] ss:$0 sm:$0xff]  ;;  %v1010_v2 = vld [vmem:[%s1492_s2] ss:$0 sm:$0xff] }
   0xf   :  { %993 = vmatpush.msra.mxu2 %v1242_v15  ;;  %206 = vmatpush.msra.mxu0 %v1242_v15  ;;  %vm234_vm7 = vcmp.eq.s32.totalorder %v61_v1, %v1010_v2 }
  0x10   :  { %v967_v17 = vsel %vm234_vm7, 1.0, %v1139_v20 }
  0x11   :  { %150 = vperm.xlu2 %1005, %v51_v5   ;;  %994 = vmatpush.msra.mxu2 %v1249_v16 }
  0x12   :  { %147 = vperm.xlu1 %1004, %v50_v4   ;;  %141 = vperm.xlu0 %1003, %v48_v8   ;;  %v296_v8 = vld [vmem:[#allocation2 + $0x58] sm:$0xff] }
  0x13   :  { %207 = vmatpush.msra.mxu0 %v1249_v16  ;;  %317 = vmatpush.msrb.mxu2 %v296_v8 }
  0x19   :  { %110 = vperm.xlu2 %1005, %v57_v10  }
  0x1a   :  { %115 = vperm.xlu1 %1004, %v58_v9   ;;  %120 = vperm.xlu0 %1003, %v59_v11   ;;  %v295_v9 = vld [vmem:[#allocation2 + $0x50] sm:$0xff] }
  0x1b   :  { %318 = vmatpush.msrb.mxu2 %v295_v9 }
  0x21   :  { %95 = vperm.xlu2 %1005, %v54_v13  }
  0x22   :  { %100 = vperm.xlu1 %1004, %v55_v12   ;;  %105 = vperm.xlu0 %1003, %v56_v14   ;;  %v294_v12 = vld [vmem:[#allocation2 + $0x48] sm:$0xff] }
  0x23   :  { %319 = vmatpush.msrb.mxu2 %v294_v12  ;;  %v393_v12 = vld [vmem:[#allocation2 + $0x78] sm:$0xff] }
  0x24   :  { %414 = vmatpush.msra.mxu3 %v393_v12 }
  0x63   :  { %v154_v19 = vpop.permute.xlu2 %153 }
  0x64   :  { %vm160_vm1 = vcmp.eq.s32.totalorder %v136_v18, %v154_v19 }
  0x65   :  { %v960_v21 = vsel %vm160_vm1, 1.0, %v1139_v20 }
  0x66   :  { %966 = vmatmul.msk.f32.vlgmr.msra.gmra.mxu2 %vm173_vm0, %v960_v21  ;;  %v63_v21 = vadd.s32 16, %v61_v1 }
  0x68   :  { %vm236_vm10 = vcmp.eq.s32.totalorder %v63_v21, %v1010_v2 }
  0x6b   :  { %v151_v30 = vpop.permute.xlu2 %150 }
  0x6c   :  { %vm159_vm6 = vcmp.eq.s32.totalorder %v136_v18, %v151_v30 }
  0x6d   :  { %v959_v31 = vsel %vm159_vm6, 1.0, %v1139_v20 }
  0x73   :  { %v111_v44 = vpop.permute.xlu2 %110 }
  0x74   :  { %v126_v48 = vmul.f32 %v1006_v32, %v111_v44 }
  0x76   :  { %v132_v55 = vadd.f32 %v1008_v35, %v126_v48 }
  0x7b   :  { %v96_v53 = vpop.permute.xlu2 %95 }
  0x7c   :  { %v139_v22 = vpop.permute.xlu0 %138  ;;  %v145_v26 = vpop.permute.xlu1 %144  ;;  %v123_v58 = vmul.f32 %v1007_v46, %v96_v53 }
  0x7d   :  { %vm155_vm2 = vcmp.eq.s32.totalorder %v136_v18, %v139_v22  ;;  %vm157_vm4 = vcmp.eq.s32.totalorder %v136_v18, %v145_v26  ;;  %v969_v22 = vsel %vm236_vm10, 1.0, %v1139_v20  ;;  %v482_v26 = vld [vmem:[#allocation2 + $0x18] sm:$0xff] }
  0x7e   :  { %v955_v23 = vsel %vm155_vm2, 1.0, %v1139_v20  ;;  %v957_v27 = vsel %vm157_vm4, 1.0, %v1139_v20  ;;  %v129_v3 = vadd.f32 %v1009_v52, %v123_v58 }
  0x7f   :  { %961 = vmatmul.msk.f32.vlgmr.msra.gmra.mxu0 %vm173_vm0, %v955_v23  ;;  %v64_v23 = vadd.s32 24, %v61_v1 }
  0x81   :  { %vm237_vm11 = vcmp.eq.s32.totalorder %v64_v23, %v1010_v2 }
  0x84   :  { %v142_v24 = vpop.permute.xlu0 %141  ;;  %v148_v28 = vpop.permute.xlu1 %147 }
  0x85   :  { %vm156_vm3 = vcmp.eq.s32.totalorder %v136_v18, %v142_v24  ;;  %vm158_vm5 = vcmp.eq.s32.totalorder %v136_v18, %v148_v28  ;;  %v62_v18 = vadd.s32 8, %v61_v1  ;;  %v970_v24 = vsel %vm237_vm11, 1.0, %v1139_v20  ;;  %v480_v28 = vld [vmem:[#allocation2 + $0x8] sm:$0xff] }
  0x86   :  { %v956_v25 = vsel %vm156_vm3, 1.0, %v1139_v20  ;;  %v958_v29 = vsel %vm158_vm5, 1.0, %v1139_v20 }
  0x87   :  { %962 = vmatmul.msk.f32.gmra.mxu0 %vm173_vm0, %v956_v25  ;;  %vm235_vm9 = vcmp.eq.s32.totalorder %v62_v18, %v1010_v2  ;;  %v293_v25 = vld [vmem:[#allocation2 + $0x40] sm:$0xff] }
  0x88   :  { %v968_v19 = vsel %vm235_vm9, 1.0, %v1139_v20  ;;  %320 = vmatpush.msrb.mxu2 %v293_v25  ;;  %v571_v25 = vld [vmem:[#allocation2 + $0x30] sm:$0xff] }
  0x8a   :  { %503 = vmatpush.msra.mxu2 %v482_v26 }
  0x8c   :  { %v121_v33 = vpop.permute.xlu0 %120  ;;  %v116_v43 = vpop.permute.xlu1 %115 }
  0x8d   :  { %v128_v34 = vmul.f32 %v1006_v32, %v121_v33  ;;  %v127_v49 = vmul.f32 %v1006_v32, %v116_v43 }
  0x8f   :  { %963 = vmatmul.msk.f32.gmra.mxu0 %vm173_vm0, %v957_v27  ;;  %v134_v36 = vadd.f32 %v1008_v35, %v128_v34  ;;  %v133_v56 = vadd.f32 %v1008_v35, %v127_v49  ;;  %v481_v27 = vld [vmem:[#allocation2 + $0x10] sm:$0xff] }
  0x90   :  { %504 = vmatpush.msra.mxu2 %v481_v27 }
  0x92   :  { %505 = vmatpush.msra.mxu2 %v480_v28  ;;  %v570_v28 = vld [vmem:[#allocation2 + $0x28] sm:$0xff] }
  0x94   :  { %v106_v47 = vpop.permute.xlu0 %105  ;;  %v101_v50 = vpop.permute.xlu1 %100 }
  0x95   :  { %v125_v51 = vmul.f32 %v1007_v46, %v106_v47  ;;  %v124_v54 = vmul.f32 %v1007_v46, %v101_v50  ;;  %v1140_v47 = vmov 32.0  }
  0x96   :  { %1031 = vrcp.f32 %v1140_v47 }
  0x97   :  { %964 = vmatmul.msk.f32.gmra.mxu0 %vm173_vm0, %v958_v29  ;;  %v131_v59 = vadd.f32 %v1009_v52, %v125_v51  ;;  %v130_v62 = vadd.f32 %v1009_v52, %v124_v54  ;;  %v479_v29 = vld [vmem:[#allocation2] sm:$0xff] }
  0x98   :  { %506 = vmatpush.msra.mxu2 %v479_v29 }
  0x9c   :  { %v1032_v48 = vpop.eup %1031 }
  0x9d   :  { %v335_v49 = vmul.f32 32.0, %v1032_v48  ;;  %vm339_vm12 = vweird.f32 %v1032_v48 }
  0x9f   :  { %965 = vmatmul.msk.f32.gmra.mxu0 %vm173_vm0, %v959_v31  ;;  %v336_v50 = vsub.f32 1.0, %v335_v49 }
  0xa1   :  { %v337_v51 = vmul.f32 %v1032_v48, %v336_v50 }
  0xa3   :  { %v338_v52 = vadd.f32 %v1032_v48, %v337_v51 }
  0xa5   :  { %v1302_v53 = vsel %vm339_vm12, %v1032_v48, %v338_v52 }
  0xe9   :  { %v224_v37 = vpop.f32.mrf.mxu2 }
  0xea   :  { %v225_v38 = vadd.f32 %v224_v37, %v134_v36 }
  0xec   :  { %v232_v39 = vmax.f32 %v225_v38, 0.0 }
  0xee   :  { %269 = vmatpush.msra.mxu1 %v232_v39 }
  0xfc   :  { %v209_v40 = vpop.f32.mrf.mxu0 }
  0xfd   :  { %v210_v10 = vadd.f32 %v209_v40, %v129_v3 }
  0xff   :  { %v227_v14 = vmax.f32 %v210_v10, 0.0 }
 0x104   :  { %v212_v41 = vpop.f32.mrf.mxu0 }
 0x105   :  { %v213_v4 = vadd.f32 %v212_v41, %v130_v62 }
 0x107   :  { %v228_v13 = vmax.f32 %v213_v4, 0.0 }
 0x10c   :  { %v215_v42 = vpop.f32.mrf.mxu0 }
 0x10d   :  { %v216_v63 = vadd.f32 %v215_v42, %v131_v59 }
 0x10f   :  { %v229_v11 = vmax.f32 %v216_v63, 0.0 }
 0x114   :  { %v218_v45 = vpop.f32.mrf.mxu0 }
 0x115   :  { %v219_v60 = vadd.f32 %v218_v45, %v132_v55 }
 0x117   :  { %v230_v5 = vmax.f32 %v219_v60, 0.0 }
 0x11c   :  { %v221_v57 = vpop.f32.mrf.mxu0 }
 0x11d   :  { %v222_v61 = vadd.f32 %v221_v57, %v133_v56 }
 0x11f   :  { %v231_v0 = vmax.f32 %v222_v61, 0.0 }
 0x121   :  { %270 = vmatpush.msra.mxu1 %v231_v0 }
 0x123   :  { %271 = vmatpush.msra.mxu1 %v230_v5 }
 0x125   :  { %272 = vmatpush.msra.mxu1 %v229_v11 }
 0x127   :  { %273 = vmatpush.msra.mxu1 %v228_v13  ;;  %v392_v13 = vld [vmem:[#allocation2 + $0x70] sm:$0xff] }
 0x128   :  { %415 = vmatpush.msra.mxu3 %v392_v13 }
 0x129   :  { %274 = vmatpush.msra.mxu1 %v227_v14  ;;  %v391_v14 = vld [vmem:[#allocation2 + $0x68] sm:$0xff] }
 0x12a   :  { %971 = vmatmul.msk.f32.vlgmr.msra.gmra.mxu1 %vm246_vm8, %v967_v17  ;;  %416 = vmatpush.msra.mxu3 %v391_v14  ;;  %v390_v17 = vld [vmem:[#allocation2 + $0x60] sm:$0xff] }
 0x12c   :  { %417 = vmatpush.msra.mxu3 %v390_v17 }
 0x132   :  { %972 = vmatmul.msk.f32.gmra.mxu1 %vm246_vm8, %v968_v19 }
 0x13a   :  { %973 = vmatmul.msk.f32.gmra.mxu1 %vm246_vm8, %v969_v22  ;;  %v572_v22 = vld [vmem:[#allocation2 + $0x38] sm:$0xff] }
 0x13b   :  { %593 = vmatpush.msrb.mxu3 %v572_v22 }
 0x13d   :  { %594 = vmatpush.msrb.mxu3 %v571_v25 }
 0x13f   :  { %595 = vmatpush.msrb.mxu3 %v570_v28 }
 0x142   :  { %974 = vmatmul.msk.f32.gmra.mxu1 %vm246_vm8, %v970_v24 }
 0x1a7   :  { %v276_v30 = vpop.f32.mrf.mxu1 }
 0x1a8   :  { %v288_v31 = vadd.f32 %v276_v30, %v1249_v16  ;;  %v1011_v16 = vld [vmem:[%s1495_s5 + $0xa] ss:$0 sm:$0xff]  ;;  %v569_v30 = vld [vmem:[#allocation2 + $0x20] sm:$0xff] }
 0x1a9   :  { %596 = vmatpush.msrb.mxu3 %v569_v30 }
 0x1aa   :  { %975 = vmatmul.msk.f32.vlgmr.msrb.gmra.mxu2 %vm173_vm0, %v288_v31 }
 0x1af   :  { %v279_v32 = vpop.f32.mrf.mxu1 }
 0x1b0   :  { %v289_v33 = vadd.f32 %v279_v32, %v1242_v15 }
 0x1b2   :  { %976 = vmatmul.msk.f32.gmra.mxu2 %vm173_vm0, %v289_v33 }
 0x1b7   :  { %v282_v20 = vpop.f32.mrf.mxu1 }
 0x1b8   :  { %v290_v34 = vadd.f32 %v282_v20, %v1212_v7 }
 0x1ba   :  { %979 = vmatmul.msk.f32.vlgmr.msra.gmra.mxu2 %vm173_vm0, %v290_v34 }
 0x1bf   :  { %v285_v35 = vpop.f32.mrf.mxu1 }
 0x1c0   :  { %v291_v36 = vadd.f32 %v285_v35, %v1207_v6  ;;  %v1012_v6 = vld [vmem:[%s1495_s5 + $0x2] ss:$0 sm:$0xff] }
 0x1c2   :  { %980 = vmatmul.msk.f32.gmra.mxu2 %vm173_vm0, %v291_v36 }
 0x22d   :  { %v322_v37 = vpop.f32.mrf.mxu2 }
 0x22e   :  { %v323_v38 = vadd.f32 %v1011_v16, %v322_v37 }
 0x230   :  { %v328_v15 = vsel %vm173_vm0, %v323_v38, 0.0 }
 0x231   :  { %329 = vadd.xlane.f32.xlu0 %v328_v15 }
 0x235   :  { %v325_v39 = vpop.f32.mrf.mxu2 }
 0x236   :  { %v326_v40 = vadd.f32 %v1011_v16, %v325_v39 }
 0x238   :  { %v331_v7 = vsel %vm173_vm0, %v326_v40, 0.0 }
 0x239   :  { %332 = vadd.xlane.f32.xlu1 %v331_v7  ;;  %v1014_v7 = vld [vmem:[%s1495_s5 + $0xc] ss:$0 sm:$0xff] }
 0x23d   :  { %v508_v41 = vpop.f32.mrf.mxu2 }
 0x23e   :  { %v509_v42 = vadd.f32 %v1012_v6, %v508_v41 }
 0x240   :  { %v514_v43 = vsel %vm173_vm0, %v509_v42, 0.0 }
 0x241   :  { %515 = vadd.xlane.f32.xlu2 %v514_v43 }
 0x245   :  { %v511_v44 = vpop.f32.mrf.mxu2 }
 0x246   :  { %v512_v45 = vadd.f32 %v1012_v6, %v511_v44 }
 0x248   :  { %v517_v46 = vsel %vm173_vm0, %v512_v45, 0.0 }
 0x249   :  { %518 = vadd.xlane.f32.xlu2 %v517_v46 }
 0x2a4   :  { %v330_v54 = vpop.xlane.xlu0 %329 }
 0x2a5   :  { %v341_v55 = vmul.f32 %v1302_v53, %v330_v54 }
 0x2a7   :  { %v1305_v56 = vsub.f32 %v323_v38, %v341_v55  ;;  %v1013_v38 = vld [vmem:[%s1495_s5 + $0xb] ss:$0 sm:$0xff] }
 0x2a9   :  { %v345_v57 = vmul.f32 %v1305_v56, %v1305_v56 }
 0x2ab   :  { %v347_v58 = vsel %vm173_vm0, %v345_v57, 0.0 }
 0x2ac   :  { %348 = vadd.xlane.f32.xlu0 %v347_v58  ;;  %v333_v59 = vpop.xlane.xlu1 %332 }
 0x2ad   :  { %v342_v60 = vmul.f32 %v1302_v53, %v333_v59 }
 0x2af   :  { %v1311_v61 = vsub.f32 %v326_v40, %v342_v60 }
 0x2b1   :  { %v346_v62 = vmul.f32 %v1311_v61, %v1311_v61 }
 0x2b3   :  { %v350_v63 = vsel %vm173_vm0, %v346_v62, 0.0 }
 0x2b4   :  { %351 = vadd.xlane.f32.xlu1 %v350_v63  ;;  %v516_v0 = vpop.xlane.xlu2 %515 }
 0x2b5   :  { %v520_v1 = vmul.f32 %v516_v0, %v1302_v53  ;;  %v1015_v0 = vld [vmem:[%s1495_s5 + $0x3] ss:$0 sm:$0xff] }
 0x2b7   :  { %v1317_v2 = vsub.f32 %v509_v42, %v520_v1 }
 0x2b9   :  { %v524_v3 = vmul.f32 %v1317_v2, %v1317_v2 }
 0x2bb   :  { %v526_v4 = vsel %vm173_vm0, %v524_v3, 0.0 }
 0x2bc   :  { %527 = vadd.xlane.f32.xlu2 %v526_v4  ;;  %v519_v5 = vpop.xlane.xlu2 %518 }
 0x2bd   :  { %v521_v8 = vmul.f32 %v519_v5, %v1302_v53 }
 0x2bf   :  { %v1323_v9 = vsub.f32 %v512_v45, %v521_v8 }
 0x2c1   :  { %v525_v10 = vmul.f32 %v1323_v9, %v1323_v9 }
 0x2c3   :  { %v529_v11 = vsel %vm173_vm0, %v525_v10, 0.0 }
 0x2c4   :  { %530 = vadd.xlane.f32.xlu0 %v529_v11 }
 0x31f   :  { %v349_v18 = vpop.xlane.xlu0 %348 }
 0x320   :  { %v353_v19 = vmul.f32 %v349_v18, %v1302_v53 }
 0x322   :  { %v355_v21 = vadd.f32 1e-05, %v353_v19 }
 0x324   :  { %1033 = vrsqrt.f32 %v355_v21  ;;  %vm363_vm14 = vweird.f32 %v355_v21 }
 0x327   :  { %v352_v23 = vpop.xlane.xlu1 %351 }
 0x328   :  { %v354_v24 = vmul.f32 %v352_v23, %v1302_v53 }
 0x32a   :  { %v1034_v26 = vpop.eup %1033  ;;  %v356_v27 = vadd.f32 1e-05, %v354_v24 }
 0x32b   :  { %v358_v29 = vmul.f32 %v1034_v26, %v355_v21  ;;  %vm364_vm13 = vweird.f32 %v1034_v26  ;;  %v1017_v21 = vld [vmem:[%s1495_s5 + $0xd] ss:$0 sm:$0xff] }
 0x32c   :  { %1035 = vrsqrt.f32 %v356_v27  ;;  %vm365_vm15 = vmor %vm363_vm14, %vm364_vm13  ;;  %vm373_vm2 = vweird.f32 %v356_v27 }
 0x32d   :  { %v359_v31 = vmul.f32 %v1034_v26, %v358_v29 }
 0x32f   :  { %v360_v32 = vmul.f32 0.5, %v359_v31  ;;  %v528_v33 = vpop.xlane.xlu2 %527 }
 0x330   :  { %v532_v20 = vmul.f32 %v528_v33, %v1302_v53 }
 0x331   :  { %v361_v34 = vsub.f32 1.5, %v360_v32 }
 0x332   :  { %v1036_v35 = vpop.eup %1035  ;;  %v534_v36 = vadd.f32 1e-05, %v532_v20 }
 0x333   :  { %v362_v16 = vmul.f32 %v1034_v26, %v361_v34  ;;  %v368_v37 = vmul.f32 %v1036_v35, %v356_v27  ;;  %vm374_vm1 = vweird.f32 %v1036_v35 }
 0x334   :  { %1037 = vrsqrt.f32 %v534_v36  ;;  %vm375_vm3 = vmor %vm373_vm2, %vm374_vm1  ;;  %vm542_vm5 = vweird.f32 %v534_v36 }
 0x335   :  { %v366_v15 = vsel %vm365_vm15, %v1034_v26, %v362_v16  ;;  %v369_v39 = vmul.f32 %v1036_v35, %v368_v37 }
 0x336   :  { %v377_v40 = vmul.f32 %v366_v15, %v1305_v56 }
 0x337   :  { %v370_v6 = vmul.f32 0.5, %v369_v39  ;;  %v531_v41 = vpop.xlane.xlu0 %530 }
 0x338   :  { %v533_v42 = vmul.f32 %v531_v41, %v1302_v53  ;;  %v381_v43 = vmul.f32 %v1013_v38, %v377_v40 }
 0x339   :  { %v371_v44 = vsub.f32 1.5, %v370_v6 }
 0x33a   :  { %v1038_v45 = vpop.eup %1037  ;;  %v535_v46 = vadd.f32 1e-05, %v533_v42  ;;  %v385_v47 = vadd.f32 %v1014_v7, %v381_v43 }
 0x33b   :  { %v372_v48 = vmul.f32 %v1036_v35, %v371_v44  ;;  %v537_v49 = vmul.f32 %v1038_v45, %v534_v36  ;;  %vm543_vm4 = vweird.f32 %v1038_v45 }
 0x33c   :  { %1039 = vrsqrt.f32 %v535_v46  ;;  %v387_v50 = vmax.f32 %v385_v47, 0.0  ;;  %vm544_vm6 = vmor %vm542_vm5, %vm543_vm4  ;;  %vm552_vm8 = vweird.f32 %v535_v46 }
 0x33d   :  { %v376_v51 = vsel %vm375_vm3, %v1036_v35, %v372_v48  ;;  %v538_v52 = vmul.f32 %v1038_v45, %v537_v49  ;;  %v662_v49 = vld [vmem:[#allocation2 + $0x98] sm:$0xff] }
 0x33e   :  { %977 = vmatmul.msk.f32.vlgmr.msra.gmra.mxu3 %vm173_vm0, %v387_v50  ;;  %v378_v54 = vmul.f32 %v376_v51, %v1311_v61  ;;  %v1016_v61 = vld [vmem:[%s1495_s5 + $0x4] ss:$0 sm:$0xff]  ;;  %683 = vmatpush.msrb.mxu2 %v662_v49  ;;  %v661_v50 = vld [vmem:[#allocation2 + $0x90] sm:$0xff]  ;;  %v660_v51 = vld [vmem:[#allocation2 + $0x88] sm:$0xff] }
 0x33f   :  { %v539_v55 = vmul.f32 0.5, %v538_v52  ;;  %v659_v52 = vld [vmem:[#allocation2 + $0x80] sm:$0xff] }
 0x340   :  { %v382_v56 = vmul.f32 %v1013_v38, %v378_v54  ;;  %684 = vmatpush.msrb.mxu2 %v661_v50  ;;  %v792_v54 = vld [vmem:[#allocation2 + $0xd8] sm:$0xff] }
 0x341   :  { %v540_v57 = vsub.f32 1.5, %v539_v55  ;;  %813 = vmatpush.msrb.mxu1 %v792_v54 }
 0x342   :  { %v1040_v58 = vpop.eup %1039  ;;  %v386_v59 = vadd.f32 %v1014_v7, %v382_v56  ;;  %685 = vmatpush.msrb.mxu2 %v660_v51 }
 0x343   :  { %v541_v60 = vmul.f32 %v1038_v45, %v540_v57  ;;  %v547_v62 = vmul.f32 %v1040_v58, %v535_v46  ;;  %vm553_vm7 = vweird.f32 %v1040_v58 }
 0x344   :  { %v388_v63 = vmax.f32 %v386_v59, 0.0  ;;  %vm554_vm9 = vmor %vm552_vm8, %vm553_vm7  ;;  %686 = vmatpush.msrb.mxu2 %v659_v52 }
 0x345   :  { %v545_v1 = vsel %vm544_vm6, %v1038_v45, %v541_v60  ;;  %v548_v3 = vmul.f32 %v1040_v58, %v547_v62 }
 0x346   :  { %v556_v4 = vmul.f32 %v545_v1, %v1317_v2  ;;  %978 = vmatmul.msk.f32.gmra.mxu3 %vm173_vm0, %v388_v63 }
 0x347   :  { %v549_v5 = vmul.f32 0.5, %v548_v3  ;;  %v789_v3 = vld [vmem:[#allocation2 + $0xc0] sm:$0xff] }
 0x348   :  { %v560_v8 = vmul.f32 %v1015_v0, %v556_v4 }
 0x349   :  { %v550_v10 = vsub.f32 1.5, %v549_v5 }
 0x34a   :  { %v564_v11 = vadd.f32 %v1016_v61, %v560_v8 }
 0x34b   :  { %v551_v12 = vmul.f32 %v1040_v58, %v550_v10 }
 0x34c   :  { %v566_v13 = vmax.f32 %v564_v11, 0.0 }
 0x34d   :  { %v555_v14 = vsel %vm554_vm9, %v1040_v58, %v551_v12  ;;  %v791_v58 = vld [vmem:[#allocation2 + $0xd0] sm:$0xff] }
 0x34e   :  { %981 = vmatmul.msk.f32.vlgmr.msrb.gmra.mxu3 %vm173_vm0, %v566_v13  ;;  %v557_v2 = vmul.f32 %v555_v14, %v1323_v9  ;;  %v1018_v9 = vld [vmem:[%s1495_s5 + $0x5] ss:$0 sm:$0xff]  ;;  %814 = vmatpush.msrb.mxu1 %v791_v58 }
 0x350   :  { %v561_v17 = vmul.f32 %v1015_v0, %v557_v2  ;;  %v790_v0 = vld [vmem:[#allocation2 + $0xc8] sm:$0xff] }
 0x351   :  { %815 = vmatpush.msrb.mxu1 %v790_v0  ;;  %v1019_v2 = vld [vmem:[%s1495_s5 + $0xe] ss:$0 sm:$0xff] }
 0x352   :  { %v565_v18 = vadd.f32 %v1016_v61, %v561_v17 }
 0x353   :  { %816 = vmatpush.msrb.mxu1 %v789_v3 }
 0x354   :  { %v567_v19 = vmax.f32 %v565_v18, 0.0 }
 0x356   :  { %982 = vmatmul.msk.f32.gmra.mxu3 %vm173_vm0, %v567_v19 }
 0x3c1   :  { %v419_v22 = vpop.f32.mrf.mxu3 }
 0x3c2   :  { %v420_v23 = vadd.f32 %v1017_v21, %v419_v22 }
 0x3c4   :  { %v425_v24 = vsel %vm173_vm0, %v420_v23, 0.0 }
 0x3c5   :  { %426 = vadd.xlane.f32.xlu1 %v425_v24 }
 0x3c9   :  { %v422_v25 = vpop.f32.mrf.mxu3 }
 0x3ca   :  { %v423_v26 = vadd.f32 %v1017_v21, %v422_v25  ;;  %v1020_v21 = vld [vmem:[%s1495_s5 + $0xf] ss:$0 sm:$0xff] }
 0x3cc   :  { %v428_v27 = vsel %vm173_vm0, %v423_v26, 0.0 }
 0x3cd   :  { %429 = vadd.xlane.f32.xlu2 %v428_v27 }
 0x3d1   :  { %v598_v28 = vpop.f32.mrf.mxu3 }
 0x3d2   :  { %v599_v29 = vadd.f32 %v1018_v9, %v598_v28 }
 0x3d4   :  { %v604_v30 = vsel %vm173_vm0, %v599_v29, 0.0 }
 0x3d5   :  { %605 = vadd.xlane.f32.xlu0 %v604_v30 }
 0x3d9   :  { %v601_v31 = vpop.f32.mrf.mxu3 }
 0x3da   :  { %v602_v32 = vadd.f32 %v1018_v9, %v601_v31 }
 0x3dc   :  { %v607_v33 = vsel %vm173_vm0, %v602_v32, 0.0 }
 0x3dd   :  { %608 = vadd.xlane.f32.xlu1 %v607_v33 }
 0x438   :  { %v427_v20 = vpop.xlane.xlu1 %426 }
 0x439   :  { %v431_v34 = vmul.f32 %v427_v20, %v1302_v53 }
 0x43b   :  { %v1363_v35 = vsub.f32 %v420_v23, %v431_v34 }
 0x43d   :  { %v435_v36 = vmul.f32 %v1363_v35, %v1363_v35 }
 0x43f   :  { %v437_v16 = vsel %vm173_vm0, %v435_v36, 0.0 }
 0x440   :  { %438 = vadd.xlane.f32.xlu2 %v437_v16  ;;  %v430_v37 = vpop.xlane.xlu2 %429 }
 0x441   :  { %v432_v38 = vmul.f32 %v430_v37, %v1302_v53 }
 0x443   :  { %v1369_v15 = vsub.f32 %v423_v26, %v432_v38 }
 0x445   :  { %v436_v39 = vmul.f32 %v1369_v15, %v1369_v15 }
 0x447   :  { %v440_v40 = vsel %vm173_vm0, %v436_v39, 0.0 }
 0x448   :  { %v606_v7 = vpop.xlane.xlu0 %605  ;;  %441 = vadd.xlane.f32.xlu0 %v440_v40 }
 0x449   :  { %v610_v6 = vmul.f32 %v606_v7, %v1302_v53  ;;  %v1021_v7 = vld [vmem:[%s1495_s5 + $0x6] ss:$0 sm:$0xff] }
 0x44b   :  { %v1375_v41 = vsub.f32 %v599_v29, %v610_v6 }
 0x44d   :  { %v614_v42 = vmul.f32 %v1375_v41, %v1375_v41 }
 0x44f   :  { %v616_v43 = vsel %vm173_vm0, %v614_v42, 0.0 }
 0x450   :  { %v609_v44 = vpop.xlane.xlu1 %608  ;;  %617 = vadd.xlane.f32.xlu1 %v616_v43 }
 0x451   :  { %v611_v45 = vmul.f32 %v609_v44, %v1302_v53 }
 0x453   :  { %v1381_v46 = vsub.f32 %v602_v32, %v611_v45 }
 0x455   :  { %v615_v47 = vmul.f32 %v1381_v46, %v1381_v46 }
 0x457   :  { %v619_v48 = vsel %vm173_vm0, %v615_v47, 0.0 }
 0x458   :  { %620 = vadd.xlane.f32.xlu2 %v619_v48 }
 0x4b3   :  { %v439_v55 = vpop.xlane.xlu2 %438 }
 0x4b4   :  { %v443_v56 = vmul.f32 %v439_v55, %v1302_v53 }
 0x4b6   :  { %v445_v57 = vadd.f32 1e-05, %v443_v56  ;;  %v1023_v56 = vld [vmem:[%s1495_s5 + $0x10] ss:$0 sm:$0xff] }
 0x4b8   :  { %1041 = vrsqrt.f32 %v445_v57  ;;  %vm453_vm11 = vweird.f32 %v445_v57 }
 0x4bb   :  { %v442_v59 = vpop.xlane.xlu0 %441 }
 0x4bc   :  { %v444_v60 = vmul.f32 %v442_v59, %v1302_v53 }
 0x4be   :  { %v1042_v62 = vpop.eup %1041  ;;  %v446_v63 = vadd.f32 1e-05, %v444_v60  ;;  %v1024_v60 = vld [vmem:[%s1495_s5 + $0x14] ss:$0 sm:$0xff] }
 0x4bf   :  { %v448_v1 = vmul.f32 %v1042_v62, %v445_v57  ;;  %vm454_vm10 = vweird.f32 %v1042_v62 }
 0x4c0   :  { %1043 = vrsqrt.f32 %v446_v63  ;;  %vm455_vm12 = vmor %vm453_vm11, %vm454_vm10  ;;  %vm463_vm14 = vweird.f32 %v446_v63 }
 0x4c1   :  { %v449_v4 = vmul.f32 %v1042_v62, %v448_v1 }
 0x4c3   :  { %v450_v61 = vmul.f32 0.5, %v449_v4  ;;  %v618_v5 = vpop.xlane.xlu1 %617 }
 0x4c4   :  { %v622_v8 = vmul.f32 %v618_v5, %v1302_v53 }
 0x4c5   :  { %v451_v10 = vsub.f32 1.5, %v450_v61 }
 0x4c6   :  { %v1044_v11 = vpop.eup %1043  ;;  %v624_v12 = vadd.f32 1e-05, %v622_v8 }
 0x4c7   :  { %v452_v13 = vmul.f32 %v1042_v62, %v451_v10  ;;  %v458_v14 = vmul.f32 %v1044_v11, %v446_v63  ;;  %vm464_vm13 = vweird.f32 %v1044_v11 }
 0x4c8   :  { %1045 = vrsqrt.f32 %v624_v12  ;;  %vm465_vm15 = vmor %vm463_vm14, %vm464_vm13  ;;  %vm632_vm2 = vweird.f32 %v624_v12 }
 0x4c9   :  { %v456_v17 = vsel %vm455_vm12, %v1042_v62, %v452_v13  ;;  %v459_v18 = vmul.f32 %v1044_v11, %v458_v14 }
 0x4ca   :  { %v467_v19 = vmul.f32 %v456_v17, %v1363_v35 }
 0x4cb   :  { %v460_v22 = vmul.f32 0.5, %v459_v18  ;;  %v621_v23 = vpop.xlane.xlu2 %620 }
 0x4cc   :  { %v471_v24 = vmul.f32 %v1019_v2, %v467_v19  ;;  %v623_v25 = vmul.f32 %v621_v23, %v1302_v53 }
 0x4cd   :  { %v461_v26 = vsub.f32 1.5, %v460_v22 }
 0x4ce   :  { %v1046_v27 = vpop.eup %1045  ;;  %v625_v9 = vadd.f32 1e-05, %v623_v25  ;;  %v475_v28 = vadd.f32 %v1020_v21, %v471_v24 }
 0x4cf   :  { %v462_v29 = vmul.f32 %v1044_v11, %v461_v26  ;;  %v627_v30 = vmul.f32 %v1046_v27, %v624_v12  ;;  %vm633_vm1 = vweird.f32 %v1046_v27 }
 0x4d0   :  { %1047 = vrsqrt.f32 %v625_v9  ;;  %v477_v31 = vmax.f32 %v475_v28, 0.0  ;;  %vm634_vm3 = vmor %vm632_vm2, %vm633_vm1  ;;  %vm642_vm5 = vweird.f32 %v625_v9 }
 0x4d1   :  { %v466_v32 = vsel %vm465_vm15, %v1044_v11, %v462_v29  ;;  %v628_v33 = vmul.f32 %v1046_v27, %v627_v30  ;;  %v752_v30 = vld [vmem:[#allocation2 + $0xb8] sm:$0xff] }
 0x4d2   :  { %983 = vmatmul.msk.f32.vlgmr.msrb.gmra.mxu2 %vm173_vm0, %v477_v31  ;;  %v468_v20 = vmul.f32 %v466_v32, %v1369_v15  ;;  %v1022_v15 = vld [vmem:[%s1495_s5 + $0x7] ss:$0 sm:$0xff]  ;;  %773 = vmatpush.msra.mxu3 %v752_v30  ;;  %v882_v31 = vld [vmem:[#allocation2 + $0xf8] sm:$0xff]  ;;  %v751_v32 = vld [vmem:[#allocation2 + $0xb0] sm:$0xff] }
 0x4d3   :  { %v629_v34 = vmul.f32 0.5, %v628_v33  ;;  %903 = vmatpush.msrb.mxu0 %v882_v31  ;;  %v750_v33 = vld [vmem:[#allocation2 + $0xa8] sm:$0xff] }
 0x4d4   :  { %v472_v35 = vmul.f32 %v1019_v2, %v468_v20  ;;  %774 = vmatpush.msra.mxu3 %v751_v32  ;;  %v749_v20 = vld [vmem:[#allocation2 + $0xa0] sm:$0xff] }
 0x4d5   :  { %v630_v36 = vsub.f32 1.5, %v629_v34 }
 0x4d6   :  { %v1048_v16 = vpop.eup %1047  ;;  %v476_v37 = vadd.f32 %v1020_v21, %v472_v35  ;;  %775 = vmatpush.msra.mxu3 %v750_v33 }
 0x4d7   :  { %v631_v38 = vmul.f32 %v1046_v27, %v630_v36  ;;  %v637_v39 = vmul.f32 %v1048_v16, %v625_v9  ;;  %vm643_vm4 = vweird.f32 %v1048_v16  ;;  %v881_v36 = vld [vmem:[#allocation2 + $0xf0] sm:$0xff] }
 0x4d8   :  { %v478_v40 = vmax.f32 %v476_v37, 0.0  ;;  %vm644_vm6 = vmor %vm642_vm5, %vm643_vm4  ;;  %776 = vmatpush.msra.mxu3 %v749_v20  ;;  %904 = vmatpush.msrb.mxu0 %v881_v36  ;;  %v880_v37 = vld [vmem:[#allocation2 + $0xe8] sm:$0xff] }
 0x4d9   :  { %v635_v6 = vsel %vm634_vm3, %v1046_v27, %v631_v38  ;;  %v638_v42 = vmul.f32 %v1048_v16, %v637_v39  ;;  %v879_v38 = vld [vmem:[#allocation2 + $0xe0] sm:$0xff] }
 0x4da   :  { %v646_v43 = vmul.f32 %v635_v6, %v1375_v41  ;;  %984 = vmatmul.msk.f32.gmra.mxu2 %vm173_vm0, %v478_v40  ;;  %905 = vmatpush.msrb.mxu0 %v880_v37 }
 0x4db   :  { %v639_v44 = vmul.f32 0.5, %v638_v42 }
 0x4dc   :  { %v650_v45 = vmul.f32 %v1021_v7, %v646_v43  ;;  %906 = vmatpush.msrb.mxu0 %v879_v38 }
 0x4dd   :  { %v640_v47 = vsub.f32 1.5, %v639_v44 }
 0x4de   :  { %v654_v48 = vadd.f32 %v1022_v15, %v650_v45 }
 0x4df   :  { %v641_v49 = vmul.f32 %v1048_v16, %v640_v47 }
 0x4e0   :  { %v656_v50 = vmax.f32 %v654_v48, 0.0 }
 0x4e1   :  { %v645_v51 = vsel %vm644_vm6, %v1048_v16, %v641_v49 }
 0x4e2   :  { %987 = vmatmul.msk.f32.vlgmr.msrb.gmra.mxu1 %vm173_vm0, %v656_v50  ;;  %v647_v41 = vmul.f32 %v645_v51, %v1381_v46 }
 0x4e4   :  { %v651_v52 = vmul.f32 %v1021_v7, %v647_v41 }
 0x4e6   :  { %v655_v54 = vadd.f32 %v1022_v15, %v651_v52 }
 0x4e8   :  { %v657_v55 = vmax.f32 %v655_v54, 0.0 }
 0x4ea   :  { %988 = vmatmul.msk.f32.gmra.mxu1 %vm173_vm0, %v657_v55  ;;  %v1025_v55 = vld [vmem:[%s1495_s5 + $0x11] ss:$0 sm:$0xff] }
 0x555   :  { %v688_v57 = vpop.f32.mrf.mxu2 }
 0x556   :  { %v689_v58 = vadd.f32 %v1023_v56, %v688_v57 }
 0x558   :  { %v694_v59 = vsel %vm173_vm0, %v689_v58, 0.0 }
 0x559   :  { %695 = vadd.xlane.f32.xlu0 %v694_v59 }
 0x55d   :  { %v691_v62 = vpop.f32.mrf.mxu2 }
 0x55e   :  { %v692_v46 = vadd.f32 %v1023_v56, %v691_v62 }
 0x55f   :  { %v818_v63 = vpop.f32.mrf.mxu1 }
 0x560   :  { %v819_v0 = vadd.f32 %v1024_v60, %v818_v63  ;;  %v697_v1 = vsel %vm173_vm0, %v692_v46, 0.0 }
 0x561   :  { %698 = vadd.xlane.f32.xlu2 %v697_v1 }
 0x562   :  { %v824_v3 = vsel %vm173_vm0, %v819_v0, 0.0 }
 0x563   :  { %825 = vadd.xlane.f32.xlu1 %v824_v3 }
 0x567   :  { %v821_v4 = vpop.f32.mrf.mxu1 }
 0x568   :  { %v822_v61 = vadd.f32 %v1024_v60, %v821_v4 }
 0x56a   :  { %v827_v5 = vsel %vm173_vm0, %v822_v61, 0.0 }
 0x56b   :  { %828 = vadd.xlane.f32.xlu0 %v827_v5 }
 0x5cc   :  { %v696_v8 = vpop.xlane.xlu0 %695 }
 0x5cd   :  { %v700_v10 = vmul.f32 %v696_v8, %v1302_v53 }
 0x5cf   :  { %v1421_v11 = vsub.f32 %v689_v58, %v700_v10 }
 0x5d1   :  { %v704_v12 = vmul.f32 %v1421_v11, %v1421_v11 }
 0x5d3   :  { %v706_v13 = vsel %vm173_vm0, %v704_v12, 0.0 }
 0x5d4   :  { %707 = vadd.xlane.f32.xlu1 %v706_v13  ;;  %v699_v14 = vpop.xlane.xlu2 %698 }
 0x5d5   :  { %v701_v2 = vmul.f32 %v699_v14, %v1302_v53  ;;  %v1027_v14 = vld [vmem:[%s1495_s5 + $0x15] ss:$0 sm:$0xff] }
 0x5d6   :  { %v826_v17 = vpop.xlane.xlu1 %825 }
 0x5d7   :  { %v1427_v18 = vsub.f32 %v692_v46, %v701_v2  ;;  %v830_v19 = vmul.f32 %v826_v17, %v1302_v53 }
 0x5d9   :  { %v1430_v21 = vsub.f32 %v819_v0, %v830_v19  ;;  %v705_v22 = vmul.f32 %v1427_v18, %v1427_v18 }
 0x5db   :  { %v709_v23 = vsel %vm173_vm0, %v705_v22, 0.0  ;;  %v834_v24 = vmul.f32 %v1430_v21, %v1430_v21 }
 0x5dc   :  { %710 = vadd.xlane.f32.xlu0 %v709_v23  ;;  %v1028_v23 = vld [vmem:[%s1495_s5 + $0x16] ss:$0 sm:$0xff] }
 0x5dd   :  { %v836_v25 = vsel %vm173_vm0, %v834_v24, 0.0 }
 0x5de   :  { %837 = vadd.xlane.f32.xlu2 %v836_v25  ;;  %v829_v26 = vpop.xlane.xlu0 %828 }
 0x5df   :  { %v831_v27 = vmul.f32 %v829_v26, %v1302_v53 }
 0x5e1   :  { %v1439_v9 = vsub.f32 %v822_v61, %v831_v27 }
 0x5e3   :  { %v835_v28 = vmul.f32 %v1439_v9, %v1439_v9 }
 0x5e5   :  { %v839_v29 = vsel %vm173_vm0, %v835_v28, 0.0 }
 0x5e6   :  { %840 = vadd.xlane.f32.xlu1 %v839_v29 }
 0x647   :  { %v708_v34 = vpop.xlane.xlu1 %707 }
 0x648   :  { %v712_v35 = vmul.f32 %v708_v34, %v1302_v53  ;;  %v1029_v34 = vld [vmem:[%s1495_s5 + $0x13] ss:$0 sm:$0xff] }
 0x64a   :  { %v714_v16 = vadd.f32 1e-05, %v712_v35 }
 0x64c   :  { %1049 = vrsqrt.f32 %v714_v16  ;;  %vm722_vm8 = vweird.f32 %v714_v16 }
 0x64f   :  { %v711_v39 = vpop.xlane.xlu0 %710 }
 0x650   :  { %v713_v40 = vmul.f32 %v711_v39, %v1302_v53 }
 0x651   :  { %v838_v7 = vpop.xlane.xlu2 %837 }
 0x652   :  { %v1050_v6 = vpop.eup %1049  ;;  %v715_v42 = vadd.f32 1e-05, %v713_v40  ;;  %v842_v43 = vmul.f32 %v838_v7, %v1302_v53 }
 0x653   :  { %v717_v15 = vmul.f32 %v1050_v6, %v714_v16  ;;  %vm723_vm7 = vweird.f32 %v1050_v6  ;;  %v1030_v16 = vld [vmem:[%s1495_s5 + $0x17] ss:$0 sm:$0xff] }
 0x654   :  { %1051 = vrsqrt.f32 %v715_v42  ;;  %v844_v44 = vadd.f32 1e-05, %v842_v43  ;;  %vm724_vm9 = vmor %vm722_vm8, %vm723_vm7  ;;  %vm732_vm11 = vweird.f32 %v715_v42 }
 0x655   :  { %v718_v45 = vmul.f32 %v1050_v6, %v717_v15 }
 0x656   :  { %1053 = vrsqrt.f32 %v844_v44  ;;  %vm852_vm14 = vweird.f32 %v844_v44 }
 0x657   :  { %v719_v47 = vmul.f32 0.5, %v718_v45 }
 0x659   :  { %v720_v48 = vsub.f32 1.5, %v719_v47  ;;  %v841_v49 = vpop.xlane.xlu1 %840 }
 0x65a   :  { %v1052_v50 = vpop.eup %1051  ;;  %v843_v51 = vmul.f32 %v841_v49, %v1302_v53  ;;  %v1026_v53 = vld [vmem:[%s1495_s5 + $0x12] ss:$0 sm:$0xff]  ;;  %s1142_s5 = smov [#allocation6]  }
 0x65b   :  { %v721_v41 = vmul.f32 %v1050_v6, %v720_v48  ;;  %v727_v52 = vmul.f32 %v1052_v50, %v715_v42  ;;  %vm733_vm10 = vweird.f32 %v1052_v50  ;;  %s935_s17 = sshll.u32 %s1142_s5, 4  ;;  %s936_s17 = int_to_ptr.vmem [resolvable:$true] %s935_s17 }
 0x65c   :  { %v1054_v54 = vpop.eup %1053  ;;  %v845_v56 = vadd.f32 1e-05, %v843_v51  ;;  %vm734_vm13 = vmor %vm732_vm11, %vm733_vm10 }
 0x65d   :  { %v725_v57 = vsel %vm724_vm9, %v1050_v6, %v721_v41  ;;  %v728_v58 = vmul.f32 %v1052_v50, %v727_v52  ;;  %v847_v59 = vmul.f32 %v1054_v54, %v844_v44  ;;  %vm853_vm12 = vweird.f32 %v1054_v54 }
 0x65e   :  { %v736_v60 = vmul.f32 %v725_v57, %v1421_v11  ;;  %1055 = vrsqrt.f32 %v845_v56  ;;  %vm854_vm15 = vmor %vm852_vm14, %vm853_vm12  ;;  %vm862_vm2 = vweird.f32 %v845_v56 }
 0x65f   :  { %v729_v62 = vmul.f32 0.5, %v728_v58  ;;  %v848_v46 = vmul.f32 %v1054_v54, %v847_v59 }
 0x660   :  { %v740_v63 = vmul.f32 %v1025_v55, %v736_v60 }
 0x661   :  { %v730_v0 = vsub.f32 1.5, %v729_v62  ;;  %v849_v1 = vmul.f32 0.5, %v848_v46 }
 0x662   :  { %v744_v3 = vadd.f32 %v1026_v53, %v740_v63 }
 0x663   :  { %v731_v4 = vmul.f32 %v1052_v50, %v730_v0  ;;  %v850_v61 = vsub.f32 1.5, %v849_v1 }
 0x664   :  { %v1056_v5 = vpop.eup %1055  ;;  %v746_v8 = vmax.f32 %v744_v3, 0.0 }
 0x665   :  { %v735_v10 = vsel %vm734_vm13, %v1052_v50, %v731_v4  ;;  %v851_v11 = vmul.f32 %v1054_v54, %v850_v61  ;;  %v857_v12 = vmul.f32 %v1056_v5, %v845_v56  ;;  %vm863_vm1 = vweird.f32 %v1056_v5 }
 0x666   :  { %985 = vmatmul.msk.f32.vlgmr.msra.gmra.mxu3 %vm173_vm0, %v746_v8  ;;  %v737_v13 = vmul.f32 %v735_v10, %v1427_v18  ;;  %vm864_vm3 = vmor %vm862_vm2, %vm863_vm1 }
 0x667   :  { %v855_v2 = vsel %vm854_vm15, %v1054_v54, %v851_v11  ;;  %v858_v17 = vmul.f32 %v1056_v5, %v857_v12 }
 0x668   :  { %v866_v19 = vmul.f32 %v855_v2, %v1430_v21  ;;  %v741_v22 = vmul.f32 %v1025_v55, %v737_v13 }
 0x669   :  { %v859_v24 = vmul.f32 0.5, %v858_v17 }
 0x66a   :  { %v745_v25 = vadd.f32 %v1026_v53, %v741_v22  ;;  %v870_v26 = vmul.f32 %v1027_v14, %v866_v19 }
 0x66b   :  { %v860_v27 = vsub.f32 1.5, %v859_v24 }
 0x66c   :  { %v747_v28 = vmax.f32 %v745_v25, 0.0  ;;  %v874_v18 = vadd.f32 %v1028_v23, %v870_v26 }
 0x66d   :  { %v861_v29 = vmul.f32 %v1056_v5, %v860_v27 }
 0x66e   :  { %986 = vmatmul.msk.f32.gmra.mxu3 %vm173_vm0, %v747_v28  ;;  %v876_v30 = vmax.f32 %v874_v18, 0.0 }
 0x66f   :  { %v865_v31 = vsel %vm864_vm3, %v1056_v5, %v861_v29 }
 0x670   :  { %989 = vmatmul.msk.f32.vlgmr.msrb.gmra.mxu0 %vm173_vm0, %v876_v30  ;;  %v867_v21 = vmul.f32 %v865_v31, %v1439_v9 }
 0x672   :  { %v871_v32 = vmul.f32 %v1027_v14, %v867_v21 }
 0x674   :  { %v875_v33 = vadd.f32 %v1028_v23, %v871_v32 }
 0x676   :  { %v877_v20 = vmax.f32 %v875_v33, 0.0 }
 0x678   :  { %990 = vmatmul.msk.f32.gmra.mxu0 %vm173_vm0, %v877_v20 }
 0x6e9   :  { %v778_v35 = vpop.f32.mrf.mxu3 }
 0x6ea   :  { %v779_v36 = vadd.f32 %v1029_v34, %v778_v35 }
 0x6ec   :  { %v784_v37 = vmax.f32 %v779_v36, 0.0 }
 0x6ed   :  { %v908_v38 = vpop.f32.mrf.mxu0 }
 0x6ee   :  { %786 = vst.msk [vmem:[#allocation5] sm:$0xff] %vm173_vm0, %v784_v37  ;;  %v909_v9 = vadd.f32 %v1030_v16, %v908_v38 }
 0x6f0   :  { %v914_v39 = vmax.f32 %v909_v9, 0.0 }
 0x6f1   :  { %v781_v40 = vpop.f32.mrf.mxu3 }
 0x6f2   :  { %916 = vst.msk [vmem:[#allocation6] sm:$0xff] %vm173_vm0, %v914_v39  ;;  %v782_v7 = vadd.f32 %v1029_v34, %v781_v40 }
 0x6f4   :  { %v785_v6 = vmax.f32 %v782_v7, 0.0 }
 0x6f5   :  { %v911_v42 = vpop.f32.mrf.mxu0 }
 0x6f6   :  { %787 = vst.msk [vmem:[#allocation5 + $0x8] sm:$0xff] %vm173_vm0, %v785_v6  ;;  %v912_v43 = vadd.f32 %v1030_v16, %v911_v42 }
 0x6f7   :  { %930 = dma.vmem_to_hbm [thread:$0]  %s923_s15, 256, %s925_s16, [#allocation4], %s1136_s29, %s1136_s29, %s1137_s30  }
 0x6f8   :  { %v915_v15 = vmax.f32 %v912_v43, 0.0 }
 0x6fa   :  { %917 = vst.msk [vmem:[#allocation6 + $0x8] sm:$0xff] %vm173_vm0, %v915_v15 }
 0x6fb   :  { %943 = dma.vmem_to_hbm [thread:$0]  %s936_s17, 256, %s938_s20, [#allocation7], %s1136_s29, %s1136_s29, %s1137_s30  }
 0x6fc   :  { %1131 = dma.done.wait [#allocation4], 256  }
 0x6fd   :  { %1132 = vsyncadd [#allocation4], 4294967040 }
 0x6fe   :  { %1133 = dma.done.wait [#allocation7], 256  }
 0x6ff   :  { %1134 = vsyncadd [#allocation7], 4294967040 }
 0x700   :  { %952 = vsyncpa [#allocation3], 1 }
 0x701   :  { %953 = vsyncpa [#allocation4], 1 }
 0x702   :  { %954 = vsyncpa [#allocation7], 1 }

</bundles_post_ra>
